<compile_context>
chip_gen: v5e
topology: v5e:2x2
jax: 0.10.0
libtpu: 0.0.40
codegen_flags: <defaults>
</compile_context>

<pallas_src>
import functools

import jax
import jax.numpy as jnp
from jax import lax
from jax.experimental import pallas as pl
from jax.experimental.pallas import tpu as pltpu

NEG_SLOPE = 0.2


def _leaky_relu(x):
    return jnp.where(x > 0, x, NEG_SLOPE * x)


def _pick_tile(n, pref):
    """Largest multiple-of-8 divisor of n that is <= pref (or n itself).

    Falling back to n keeps the block legal (block dim == full dim) but may
    be large for awkward n; pick point counts that are multiples of 8.
    """
    if n <= pref:
        return n
    for t in range(pref, 7, -8):
        if n % t == 0:
            return t
    return n


# ---------------------------------------------------------------------------
# Fused kernel: input embedding + modified self-attention (flash-style online
# softmax) + MLP stack + final_fc.
#
# grid = (B, num_i_tiles, num_j_tiles); j is the softmax reduction axis
# ("arbitrary", last).  The output block depends only on (b, i), so it stays
# resident across j and is written once at j == last (accumulator pattern).
# Per-(b, i) state (x_i embedding, K_i, m, l, acc) lives in VMEM scratch and
# is (re)initialised under j == 0.
# ---------------------------------------------------------------------------
def _make_kernel(n_mlp, M):
    def kernel(*refs):
        xin_i_ref, xin_j_ref = refs[0], refs[1]
        w_in_ref, b_in_ref = refs[2], refs[3]
        w_k_ref, b_k_ref = refs[4], refs[5]
        w_qv_ref, b_qv_ref = refs[6], refs[7]
        mlp_refs = refs[8:8 + 2 * n_mlp]
        w_f_ref = refs[8 + 2 * n_mlp]
        b_f_ref = refs[9 + 2 * n_mlp]
        out_ref = refs[10 + 2 * n_mlp]
        xi_ref, ki_ref, m_ref, l_ref, acc_ref = refs[11 + 2 * n_mlp:]

        j = pl.program_id(2)
        nj = pl.num_programs(2)

        # ---- per-(b, i) init: embed x_i, project K_i, reset accumulators ---
        @pl.when(j == 0)
        def _():
            xi = jnp.dot(xin_i_ref[0], w_in_ref[...],
                         preferred_element_type=jnp.float32) + b_in_ref[...]
            xi = _leaky_relu(xi)                               # (TI, C0) f32
            xi_ref[...] = xi
            ki = jnp.dot(xi.astype(jnp.bfloat16), w_k_ref[...],
                         preferred_element_type=jnp.float32) + b_k_ref[...]
            ki_ref[...] = ki.astype(jnp.bfloat16)              # (TI, M) bf16
            m_ref[...] = jnp.full(m_ref.shape, -jnp.inf, dtype=jnp.float32)
            l_ref[...] = jnp.zeros(l_ref.shape, dtype=jnp.float32)
            acc_ref[...] = jnp.zeros(acc_ref.shape, dtype=jnp.float32)

        # ---- streamed side: embed x_j, fused [Q*scale | V] projection ------
        xj = jnp.dot(xin_j_ref[0], w_in_ref[...],
                     preferred_element_type=jnp.float32) + b_in_ref[...]
        xj = _leaky_relu(xj).astype(jnp.bfloat16)              # (TJ, C0)
        qv = jnp.dot(xj, w_qv_ref[...],
                     preferred_element_type=jnp.float32) + b_qv_ref[...]
        q_j = qv[:, :M].astype(jnp.bfloat16)                   # (TJ, M)
        v_j = qv[:, M:].astype(jnp.bfloat16)                   # (TJ, C0)

        # Modified attention: score[i, j] = K_i . Q_j, softmax over j.
        s = lax.dot_general(ki_ref[...], q_j,
                            (((1,), (1,)), ((), ())),
                            preferred_element_type=jnp.float32)  # (TI, TJ)

        m_prev = m_ref[...]                                    # (TI, 1)
        m_new = jnp.maximum(m_prev, jnp.max(s, axis=-1, keepdims=True))
        alpha = jnp.exp(m_prev - m_new)
        p = jnp.exp(s - m_new)                                 # (TI, TJ)
        l_ref[...] = alpha * l_ref[...] + jnp.sum(p, axis=-1, keepdims=True)
        acc_ref[...] = alpha * acc_ref[...] + jnp.dot(
            p.astype(jnp.bfloat16), v_j, preferred_element_type=jnp.float32)
        m_ref[...] = m_new

        # ---- finalize: residual + MLP stack + final_fc ----------------------
        @pl.when(j == nj - 1)
        def _():
            inv_l = pl.reciprocal(l_ref[...], approx=True)
            h = xi_ref[...] + acc_ref[...] * inv_l             # (TI, C0) f32
            for li in range(n_mlp):
                w_r = mlp_refs[2 * li]
                b_r = mlp_refs[2 * li + 1]
                h = jnp.dot(h.astype(jnp.bfloat16), w_r[...],
                            preferred_element_type=jnp.float32) + b_r[...]
                h = _leaky_relu(h)
            y = jnp.dot(h.astype(jnp.bfloat16), w_f_ref[...],
                        preferred_element_type=jnp.float32) + b_f_ref[...]
            out_ref[0] = y.astype(out_ref.dtype)

    return kernel


def pc_mlp_forward(pc_0, z, params, *, K_gen, att_M=64,
                   tile_q=512, tile_k=512):
    """params: list of (W, b), W shaped (in, out), in order
    [linear_pc, linear_z, linear_class, MLP_Q, MLP_K, MLP_V, MLP..., final_fc].
    """
    B, N, _ = pc_0.shape
    n_mlp = len(params) - 7

    (w_pc, b_pc), (w_z, b_z), (w_cls, b_cls), \
        (w_q, b_q), (w_k, b_k), (w_v, b_v) = params[:6]
    mlps = params[6:-1]
    w_f, b_f = params[-1]
    C0 = w_pc.shape[1]
    M = w_q.shape[1]

    # ---- param prep --------------------------------------------------------
    # fused input linear (one Din=3+Z+cls contraction instead of three),
    # kept in f32 for coordinate accuracy (it is memory-bound anyway)
    w_in = jnp.concatenate([w_pc, w_z, w_cls], axis=0).astype(jnp.float32)
    b_in = (b_pc + b_z + b_cls).reshape(1, -1).astype(jnp.float32)

    # fold 1/sqrt(M) into Q and fuse the streamed-side Q|V projections
    scale = 1.0 / (float(att_M) ** 0.5)
    w_qv = jnp.concatenate([w_q * scale, w_v], axis=1).astype(jnp.bfloat16)
    b_qv = jnp.concatenate([b_q * scale, b_v],
                           axis=0).reshape(1, -1).astype(jnp.float32)

    out_dim = 3 * K_gen

    wparams = [
        w_in, b_in,
        w_k.astype(jnp.bfloat16), b_k.reshape(1, -1).astype(jnp.float32),
        w_qv, b_qv,
    ]
    for (w, b) in mlps:
        wparams.append(w.astype(jnp.bfloat16))
        wparams.append(b.reshape(1, -1).astype(jnp.float32))
    wparams.append(w_f.astype(jnp.bfloat16))
    wparams.append(b_f.reshape(1, -1).astype(jnp.float32))

    # concatenated raw input [pc | z | class] — the only streamed tensor
    xin = jnp.concatenate([pc_0[:, :, :3], z, pc_0[:, :, 3:]],
                          axis=-1).astype(jnp.float32)
    Din = xin.shape[-1]

    TI = _pick_tile(N, tile_q)
    TJ = _pick_tile(N, tile_k)

    wspecs = [pl.BlockSpec(p.shape, lambda b, i, j: (0, 0)) for p in wparams]

    out = pl.pallas_call(
        _make_kernel(n_mlp, M),
        out_shape=jax.ShapeDtypeStruct((B, N, out_dim), jnp.float32),
        grid=(B, N // TI, N // TJ),
        in_specs=[
            pl.BlockSpec((1, TI, Din), lambda b, i, j: (b, i, 0)),
            pl.BlockSpec((1, TJ, Din), lambda b, i, j: (b, j, 0)),
        ] + wspecs,
        out_specs=pl.BlockSpec((1, TI, out_dim), lambda b, i, j: (b, i, 0)),
        scratch_shapes=[
            pltpu.VMEM((TI, C0), jnp.float32),      # x_i embedding (residual)
            pltpu.VMEM((TI, M), jnp.bfloat16),      # hoisted K_i, reused per j
            pltpu.VMEM((TI, 1), jnp.float32),       # running max m
            pltpu.VMEM((TI, 1), jnp.float32),       # running denom l
            pltpu.VMEM((TI, C0), jnp.float32),      # unnormalised attn @ V
        ],
        compiler_params=pltpu.CompilerParams(
            dimension_semantics=("parallel", "parallel", "arbitrary"),
            vmem_limit_bytes=32 * 1024 * 1024),     # safe on v7x's 64 MiB
    )(xin, xin, *wparams)

    # ---- wrapper epilogue: reshape + add point-cloud residual --------------
    y = out.reshape(B, N * K_gen, 3)
    pc_rep = jnp.repeat(pc_0[:, :, :3], K_gen, axis=1)        # (B, N*K, 3)
    return y + pc_rep


def reference_forward(pc_0, z, params, *, K_gen, att_M=64):
    """Pure-JAX f32 reference mirroring the PyTorch forward."""
    (w_pc, b_pc), (w_z, b_z), (w_cls, b_cls), \
        (w_q, b_q), (w_k, b_k), (w_v, b_v) = params[:6]
    mlps = params[6:-1]
    w_f, b_f = params[-1]

    pc = pc_0[:, :, :3]
    cls_ = pc_0[:, :, 3:]
    x = (pc @ w_pc + b_pc) + (z @ w_z + b_z) + (cls_ @ w_cls + b_cls)
    x = jnp.where(x > 0, x, NEG_SLOPE * x)

    q = x @ w_q + b_q
    k = x @ w_k + b_k
    v = x @ w_v + b_v
    score = jnp.einsum('bnm,bpm->bnp', k, q) / (att_M ** 0.5)
    attn = jax.nn.softmax(score, axis=-1)
    x = x + jnp.einsum('bnp,bpc->bnc', attn, v)

    B, N, _ = x.shape
    x = x.reshape(B * N, -1)
    for w, b in mlps:
        x = x @ w + b
        x = jnp.where(x > 0, x, NEG_SLOPE * x)
    x = x @ w_f + b_f
    x = x.reshape(-1, K_gen, 3)
    pcr = pc.reshape(B * N, 1, 3)
    out = pcr + x
    return out.reshape(B, -1, 3)


def init_linear(key, fan_in, fan_out):
    k1, k2 = jax.random.split(key)
    w = jax.random.normal(k1, (fan_in, fan_out), jnp.float32) / jnp.sqrt(
        jnp.float32(fan_in))
    b = 0.01 * jax.random.normal(k2, (fan_out,), jnp.float32)
    return w, b


if __name__ == "__main__":
    # Small config consistent with the module's __init__ / forward.
    B, N = 2, 256               # batch, points per cloud
    class_num = 5
    Z_dim = 16
    feat_channels = [32, 64]    # layer_num = 1
    K_gen = 4                   # points generated per input point (self.K)
    att_M = 64                  # Self_Attention_Layer M

    root = jax.random.PRNGKey(0)
    keys = jax.random.split(root, 16)

    C0 = feat_channels[0]
    params = [
        init_linear(keys[0], 3, C0),            # linear_pc
        init_linear(keys[1], Z_dim, C0),        # linear_z
        init_linear(keys[2], class_num, C0),    # linear_class
        init_linear(keys[3], C0, att_M),        # MLP_Q
        init_linear(keys[4], C0, att_M),        # MLP_K
        init_linear(keys[5], C0, C0),           # MLP_V
    ]
    kidx = 6
    for i in range(len(feat_channels) - 1):
        params.append(init_linear(keys[kidx], feat_channels[i],
                                  feat_channels[i + 1]))
        kidx += 1
    params.append(init_linear(keys[kidx], feat_channels[-1], 3 * K_gen))
    kidx += 1

    pc_0 = jax.random.normal(keys[kidx], (B, N, 3 + class_num), jnp.float32)
    z = jax.random.normal(keys[kidx + 1], (B, N, Z_dim), jnp.float32)

    # small tiles here so the demo exercises multi-tile flash accumulation
    fwd = jax.jit(functools.partial(pc_mlp_forward, K_gen=K_gen, att_M=att_M,
                                    tile_q=128, tile_k=128))
    out = jax.block_until_ready(fwd(pc_0, z, params))

    ref = jax.block_until_ready(
        reference_forward(pc_0, z, params, K_gen=K_gen, att_M=att_M))

    assert out.shape == (B, N * K_gen, 3), out.shape
    # bf16 MXU operands + approx reciprocal -> loose tolerance vs pure f32
    assert jnp.allclose(out, ref, rtol=5e-2, atol=5e-2), (
        float(jnp.max(jnp.abs(out - ref))))

    print("KERNEL_OK")
</pallas_src>

<mosaic_0001>
module attributes {stable_mosaic.version = 11 : i64} {
  func.func @kernel(%arg0: i32, %arg1: i32, %arg2: i32, %arg3: memref<1x128x24xf32, #tpu.memory_space<vmem>>, %arg4: memref<1x128x24xf32, #tpu.memory_space<vmem>>, %arg5: memref<24x32xf32, #tpu.memory_space<vmem>>, %arg6: memref<1x32xf32, #tpu.memory_space<vmem>>, %arg7: memref<32x64xbf16, #tpu.memory_space<vmem>>, %arg8: memref<1x64xf32, #tpu.memory_space<vmem>>, %arg9: memref<32x96xbf16, #tpu.memory_space<vmem>>, %arg10: memref<1x96xf32, #tpu.memory_space<vmem>>, %arg11: memref<32x64xbf16, #tpu.memory_space<vmem>>, %arg12: memref<1x64xf32, #tpu.memory_space<vmem>>, %arg13: memref<64x12xbf16, #tpu.memory_space<vmem>>, %arg14: memref<1x12xf32, #tpu.memory_space<vmem>>, %arg15: memref<1x128x12xf32, #tpu.memory_space<vmem>>, %arg16: memref<128x32xf32, #tpu.memory_space<vmem>>, %arg17: memref<128x64xbf16, #tpu.memory_space<vmem>>, %arg18: memref<128x1xf32, #tpu.memory_space<vmem>>, %arg19: memref<128x1xf32, #tpu.memory_space<vmem>>, %arg20: memref<128x32xf32, #tpu.memory_space<vmem>>) attributes {dimension_semantics = [#tpu.dimension_semantics<parallel>, #tpu.dimension_semantics<parallel>, #tpu.dimension_semantics<arbitrary>], iteration_bounds = array<i64: 2, 2, 2>, scalar_prefetch = 0 : i64, scratch_operands = 5 : i64, tpu.core_type = #tpu.core_type<tc>, window_params = [{transform_indices = @transform_0, window_bounds = array<i64: 1, 128, 24>}, {transform_indices = @transform_1, window_bounds = array<i64: 1, 128, 24>}, {pipeline_mode = #tpu.pipeline_mode<synchronous>, transform_indices = @transform_2, window_bounds = array<i64: 24, 32>}, {pipeline_mode = #tpu.pipeline_mode<synchronous>, transform_indices = @transform_3, window_bounds = array<i64: 1, 32>}, {pipeline_mode = #tpu.pipeline_mode<synchronous>, transform_indices = @transform_4, window_bounds = array<i64: 32, 64>}, {pipeline_mode = #tpu.pipeline_mode<synchronous>, transform_indices = @transform_5, window_bounds = array<i64: 1, 64>}, {pipeline_mode = #tpu.pipeline_mode<synchronous>, transform_indices = @transform_6, window_bounds = array<i64: 32, 96>}, {pipeline_mode = #tpu.pipeline_mode<synchronous>, transform_indices = @transform_7, window_bounds = array<i64: 1, 96>}, {pipeline_mode = #tpu.pipeline_mode<synchronous>, transform_indices = @transform_8, window_bounds = array<i64: 32, 64>}, {pipeline_mode = #tpu.pipeline_mode<synchronous>, transform_indices = @transform_9, window_bounds = array<i64: 1, 64>}, {pipeline_mode = #tpu.pipeline_mode<synchronous>, transform_indices = @transform_10, window_bounds = array<i64: 64, 12>}, {pipeline_mode = #tpu.pipeline_mode<synchronous>, transform_indices = @transform_11, window_bounds = array<i64: 1, 12>}, {transform_indices = @transform_12, window_bounds = array<i64: 1, 128, 12>}]} {
    %c0_i32 = arith.constant 0 : i32
    %0 = arith.cmpi eq, %arg2, %c0_i32 : i32
    %1 = arith.extui %0 : i1 to i32
    %c0_i32_0 = arith.constant 0 : i32
    %2 = arith.cmpi ne, %1, %c0_i32_0 : i32
    scf.if %2 {
      %c0_33 = arith.constant 0 : index
      %c0_34 = arith.constant 0 : index
      %c0_35 = arith.constant 0 : index
      %53 = vector.load %arg3[%c0_33, %c0_34, %c0_35] : memref<1x128x24xf32, #tpu.memory_space<vmem>>, vector<1x128x24xf32>
      %54 = vector.shape_cast %53 : vector<1x128x24xf32> to vector<128x24xf32>
      %c0_36 = arith.constant 0 : index
      %c0_37 = arith.constant 0 : index
      %55 = vector.load %arg5[%c0_36, %c0_37] : memref<24x32xf32, #tpu.memory_space<vmem>>, vector<24x32xf32>
      %cst_38 = arith.constant dense<0.000000e+00> : vector<128x32xf32>
      %56 = tpu.matmul %54, %55, %cst_38 {dimension_numbers = #tpu.dot_dimension_numbers<[1], [0], [0], [1], [0, 0, 1, 1], [], []>} : vector<128x24xf32>, vector<24x32xf32>, vector<128x32xf32> -> vector<128x32xf32>
      %c0_39 = arith.constant 0 : index
      %c0_40 = arith.constant 0 : index
      %57 = vector.load %arg6[%c0_39, %c0_40] : memref<1x32xf32, #tpu.memory_space<vmem>>, vector<1x32xf32>
      %58 = vector.broadcast %57 : vector<1x32xf32> to vector<128x32xf32>
      %59 = arith.addf %56, %58 : vector<128x32xf32>
      %cst_41 = arith.constant 0.000000e+00 : f32
      %60 = vector.broadcast %cst_41 : f32 to vector<128x32xf32>
      %61 = arith.cmpf ogt, %59, %60 : vector<128x32xf32>
      %cst_42 = arith.constant 2.000000e-01 : f32
      %62 = vector.broadcast %cst_42 : f32 to vector<128x32xf32>
      %63 = arith.mulf %62, %59 : vector<128x32xf32>
      %64 = arith.select %61, %59, %63 : vector<128x32xi1>, vector<128x32xf32>
      %c0_43 = arith.constant 0 : index
      %c0_44 = arith.constant 0 : index
      %65 = vector.load %arg16[%c0_43, %c0_44] : memref<128x32xf32, #tpu.memory_space<vmem>>, vector<128x32xf32>
      tpu.vector_store %arg16[%c0_43, %c0_44], %64 {strides = array<i32>} : memref<128x32xf32, #tpu.memory_space<vmem>>, vector<128x32xf32>,
      %66 = arith.truncf %64 : vector<128x32xf32> to vector<128x32xbf16>
      %c0_45 = arith.constant 0 : index
      %c0_46 = arith.constant 0 : index
      %67 = vector.load %arg7[%c0_45, %c0_46] : memref<32x64xbf16, #tpu.memory_space<vmem>>, vector<32x64xbf16>
      %cst_47 = arith.constant dense<0.000000e+00> : vector<128x64xf32>
      %68 = tpu.matmul %66, %67, %cst_47 {dimension_numbers = #tpu.dot_dimension_numbers<[1], [0], [0], [1], [0, 0, 1, 1], [], []>} : vector<128x32xbf16>, vector<32x64xbf16>, vector<128x64xf32> -> vector<128x64xf32>
      %c0_48 = arith.constant 0 : index
      %c0_49 = arith.constant 0 : index
      %69 = vector.load %arg8[%c0_48, %c0_49] : memref<1x64xf32, #tpu.memory_space<vmem>>, vector<1x64xf32>
      %70 = vector.broadcast %69 : vector<1x64xf32> to vector<128x64xf32>
      %71 = arith.addf %68, %70 : vector<128x64xf32>
      %72 = arith.truncf %71 : vector<128x64xf32> to vector<128x64xbf16>
      %c0_50 = arith.constant 0 : index
      %c0_51 = arith.constant 0 : index
      %73 = vector.load %arg17[%c0_50, %c0_51] : memref<128x64xbf16, #tpu.memory_space<vmem>>, vector<128x64xbf16>
      tpu.vector_store %arg17[%c0_50, %c0_51], %72 {strides = array<i32>} : memref<128x64xbf16, #tpu.memory_space<vmem>>, vector<128x64xbf16>,
      %cst_52 = arith.constant 0xFF800000 : f32
      %74 = vector.broadcast %cst_52 : f32 to vector<128x1xf32>
      %c0_53 = arith.constant 0 : index
      %c0_54 = arith.constant 0 : index
      %75 = vector.load %arg18[%c0_53, %c0_54] : memref<128x1xf32, #tpu.memory_space<vmem>>, vector<128x1xf32>
      tpu.vector_store %arg18[%c0_53, %c0_54], %74 {strides = array<i32>} : memref<128x1xf32, #tpu.memory_space<vmem>>, vector<128x1xf32>,
      %cst_55 = arith.constant 0.000000e+00 : f32
      %76 = vector.broadcast %cst_55 : f32 to vector<128x1xf32>
      %c0_56 = arith.constant 0 : index
      %c0_57 = arith.constant 0 : index
      %77 = vector.load %arg19[%c0_56, %c0_57] : memref<128x1xf32, #tpu.memory_space<vmem>>, vector<128x1xf32>
      tpu.vector_store %arg19[%c0_56, %c0_57], %76 {strides = array<i32>} : memref<128x1xf32, #tpu.memory_space<vmem>>, vector<128x1xf32>,
      %cst_58 = arith.constant 0.000000e+00 : f32
      %78 = vector.broadcast %cst_58 : f32 to vector<128x32xf32>
      %c0_59 = arith.constant 0 : index
      %c0_60 = arith.constant 0 : index
      %79 = vector.load %arg20[%c0_59, %c0_60] : memref<128x32xf32, #tpu.memory_space<vmem>>, vector<128x32xf32>
      tpu.vector_store %arg20[%c0_59, %c0_60], %78 {strides = array<i32>} : memref<128x32xf32, #tpu.memory_space<vmem>>, vector<128x32xf32>,
    } else {
    }
    %c0 = arith.constant 0 : index
    %c0_1 = arith.constant 0 : index
    %c0_2 = arith.constant 0 : index
    %3 = vector.load %arg4[%c0, %c0_1, %c0_2] : memref<1x128x24xf32, #tpu.memory_space<vmem>>, vector<1x128x24xf32>
    %4 = vector.shape_cast %3 : vector<1x128x24xf32> to vector<128x24xf32>
    %c0_3 = arith.constant 0 : index
    %c0_4 = arith.constant 0 : index
    %5 = vector.load %arg5[%c0_3, %c0_4] : memref<24x32xf32, #tpu.memory_space<vmem>>, vector<24x32xf32>
    %cst = arith.constant dense<0.000000e+00> : vector<128x32xf32>
    %6 = tpu.matmul %4, %5, %cst {dimension_numbers = #tpu.dot_dimension_numbers<[1], [0], [0], [1], [0, 0, 1, 1], [], []>} : vector<128x24xf32>, vector<24x32xf32>, vector<128x32xf32> -> vector<128x32xf32>
    %c0_5 = arith.constant 0 : index
    %c0_6 = arith.constant 0 : index
    %7 = vector.load %arg6[%c0_5, %c0_6] : memref<1x32xf32, #tpu.memory_space<vmem>>, vector<1x32xf32>
    %8 = vector.broadcast %7 : vector<1x32xf32> to vector<128x32xf32>
    %9 = arith.addf %6, %8 : vector<128x32xf32>
    %cst_7 = arith.constant 0.000000e+00 : f32
    %10 = vector.broadcast %cst_7 : f32 to vector<128x32xf32>
    %11 = arith.cmpf ogt, %9, %10 : vector<128x32xf32>
    %cst_8 = arith.constant 2.000000e-01 : f32
    %12 = vector.broadcast %cst_8 : f32 to vector<128x32xf32>
    %13 = arith.mulf %12, %9 : vector<128x32xf32>
    %14 = arith.select %11, %9, %13 : vector<128x32xi1>, vector<128x32xf32>
    %15 = arith.truncf %14 : vector<128x32xf32> to vector<128x32xbf16>
    %c0_9 = arith.constant 0 : index
    %c0_10 = arith.constant 0 : index
    %16 = vector.load %arg9[%c0_9, %c0_10] : memref<32x96xbf16, #tpu.memory_space<vmem>>, vector<32x96xbf16>
    %cst_11 = arith.constant dense<0.000000e+00> : vector<128x96xf32>
    %17 = tpu.matmul %15, %16, %cst_11 {dimension_numbers = #tpu.dot_dimension_numbers<[1], [0], [0], [1], [0, 0, 1, 1], [], []>} : vector<128x32xbf16>, vector<32x96xbf16>, vector<128x96xf32> -> vector<128x96xf32>
    %c0_12 = arith.constant 0 : index
    %c0_13 = arith.constant 0 : index
    %18 = vector.load %arg10[%c0_12, %c0_13] : memref<1x96xf32, #tpu.memory_space<vmem>>, vector<1x96xf32>
    %19 = vector.broadcast %18 : vector<1x96xf32> to vector<128x96xf32>
    %20 = arith.addf %17, %19 : vector<128x96xf32>
    %21 = vector.extract_strided_slice %20 {offsets = [0, 0], sizes = [128, 64], strides = [1, 1]} : vector<128x96xf32> to vector<128x64xf32>
    %22 = arith.truncf %21 : vector<128x64xf32> to vector<128x64xbf16>
    %23 = vector.extract_strided_slice %20 {offsets = [0, 64], sizes = [128, 32], strides = [1, 1]} : vector<128x96xf32> to vector<128x32xf32>
    %24 = arith.truncf %23 : vector<128x32xf32> to vector<128x32xbf16>
    %c0_14 = arith.constant 0 : index
    %c0_15 = arith.constant 0 : index
    %25 = vector.load %arg17[%c0_14, %c0_15] : memref<128x64xbf16, #tpu.memory_space<vmem>>, vector<128x64xbf16>
    %cst_16 = arith.constant dense<0.000000e+00> : vector<128x128xf32>
    %26 = tpu.matmul %25, %22, %cst_16 {dimension_numbers = #tpu.dot_dimension_numbers<[1], [1], [0], [0], [0, 0, 1, 0], [], []>} : vector<128x64xbf16>, vector<128x64xbf16>, vector<128x128xf32> -> vector<128x128xf32>
    %c0_17 = arith.constant 0 : index
    %c0_18 = arith.constant 0 : index
    %27 = vector.load %arg18[%c0_17, %c0_18] : memref<128x1xf32, #tpu.memory_space<vmem>>, vector<128x1xf32>
    %cst_19 = arith.constant dense<0xFF800000> : vector<128xf32>
    %28 = vector.multi_reduction <maximumf>, %26, %cst_19 [1] : vector<128x128xf32> to vector<128xf32>
    %29 = vector.shape_cast %28 : vector<128xf32> to vector<128x1xf32>
    %30 = arith.maximumf %27, %29 : vector<128x1xf32>
    %31 = arith.subf %27, %30 : vector<128x1xf32>
    %32 = math.exp %31 : vector<128x1xf32>
    %33 = vector.broadcast %30 : vector<128x1xf32> to vector<128x128xf32>
    %34 = arith.subf %26, %33 : vector<128x128xf32>
    %35 = math.exp %34 : vector<128x128xf32>
    %c0_20 = arith.constant 0 : index
    %c0_21 = arith.constant 0 : index
    %36 = vector.load %arg19[%c0_20, %c0_21] : memref<128x1xf32, #tpu.memory_space<vmem>>, vector<128x1xf32>
    %37 = arith.mulf %32, %36 : vector<128x1xf32>
    %cst_22 = arith.constant dense<0.000000e+00> : vector<128xf32>
    %38 = vector.multi_reduction <add>, %35, %cst_22 [1] : vector<128x128xf32> to vector<128xf32>
    %39 = vector.shape_cast %38 : vector<128xf32> to vector<128x1xf32>
    %40 = arith.addf %37, %39 : vector<128x1xf32>
    %c0_23 = arith.constant 0 : index
    %c0_24 = arith.constant 0 : index
    %41 = vector.load %arg19[%c0_23, %c0_24] : memref<128x1xf32, #tpu.memory_space<vmem>>, vector<128x1xf32>
    tpu.vector_store %arg19[%c0_23, %c0_24], %40 {strides = array<i32>} : memref<128x1xf32, #tpu.memory_space<vmem>>, vector<128x1xf32>,
    %c0_25 = arith.constant 0 : index
    %c0_26 = arith.constant 0 : index
    %42 = vector.load %arg20[%c0_25, %c0_26] : memref<128x32xf32, #tpu.memory_space<vmem>>, vector<128x32xf32>
    %43 = vector.broadcast %32 : vector<128x1xf32> to vector<128x32xf32>
    %44 = arith.mulf %43, %42 : vector<128x32xf32>
    %45 = arith.truncf %35 : vector<128x128xf32> to vector<128x128xbf16>
    %cst_27 = arith.constant dense<0.000000e+00> : vector<128x32xf32>
    %46 = tpu.matmul %45, %24, %cst_27 {dimension_numbers = #tpu.dot_dimension_numbers<[1], [0], [0], [1], [0, 0, 1, 1], [], []>} : vector<128x128xbf16>, vector<128x32xbf16>, vector<128x32xf32> -> vector<128x32xf32>
    %47 = arith.addf %44, %46 : vector<128x32xf32>
    %c0_28 = arith.constant 0 : index
    %c0_29 = arith.constant 0 : index
    %48 = vector.load %arg20[%c0_28, %c0_29] : memref<128x32xf32, #tpu.memory_space<vmem>>, vector<128x32xf32>
    tpu.vector_store %arg20[%c0_28, %c0_29], %47 {strides = array<i32>} : memref<128x32xf32, #tpu.memory_space<vmem>>, vector<128x32xf32>,
    %c0_30 = arith.constant 0 : index
    %c0_31 = arith.constant 0 : index
    %49 = vector.load %arg18[%c0_30, %c0_31] : memref<128x1xf32, #tpu.memory_space<vmem>>, vector<128x1xf32>
    tpu.vector_store %arg18[%c0_30, %c0_31], %30 {strides = array<i32>} : memref<128x1xf32, #tpu.memory_space<vmem>>, vector<128x1xf32>,
    %c1_i32 = arith.constant 1 : i32
    %50 = arith.cmpi eq, %arg2, %c1_i32 : i32
    %51 = arith.extui %50 : i1 to i32
    %c0_i32_32 = arith.constant 0 : i32
    %52 = arith.cmpi ne, %51, %c0_i32_32 : i32
    scf.if %52 {
      %c0_33 = arith.constant 0 : index
      %c0_34 = arith.constant 0 : index
      %53 = vector.load %arg19[%c0_33, %c0_34] : memref<128x1xf32, #tpu.memory_space<vmem>>, vector<128x1xf32>
      %54 = tpu.reciprocal %53 {approx = true} : vector<128x1xf32> -> vector<128x1xf32>
      %c0_35 = arith.constant 0 : index
      %c0_36 = arith.constant 0 : index
      %55 = vector.load %arg16[%c0_35, %c0_36] : memref<128x32xf32, #tpu.memory_space<vmem>>, vector<128x32xf32>
      %c0_37 = arith.constant 0 : index
      %c0_38 = arith.constant 0 : index
      %56 = vector.load %arg20[%c0_37, %c0_38] : memref<128x32xf32, #tpu.memory_space<vmem>>, vector<128x32xf32>
      %57 = vector.broadcast %54 : vector<128x1xf32> to vector<128x32xf32>
      %58 = arith.mulf %56, %57 : vector<128x32xf32>
      %59 = arith.addf %55, %58 : vector<128x32xf32>
      %60 = arith.truncf %59 : vector<128x32xf32> to vector<128x32xbf16>
      %c0_39 = arith.constant 0 : index
      %c0_40 = arith.constant 0 : index
      %61 = vector.load %arg11[%c0_39, %c0_40] : memref<32x64xbf16, #tpu.memory_space<vmem>>, vector<32x64xbf16>
      %cst_41 = arith.constant dense<0.000000e+00> : vector<128x64xf32>
      %62 = tpu.matmul %60, %61, %cst_41 {dimension_numbers = #tpu.dot_dimension_numbers<[1], [0], [0], [1], [0, 0, 1, 1], [], []>} : vector<128x32xbf16>, vector<32x64xbf16>, vector<128x64xf32> -> vector<128x64xf32>
      %c0_42 = arith.constant 0 : index
      %c0_43 = arith.constant 0 : index
      %63 = vector.load %arg12[%c0_42, %c0_43] : memref<1x64xf32, #tpu.memory_space<vmem>>, vector<1x64xf32>
      %64 = vector.broadcast %63 : vector<1x64xf32> to vector<128x64xf32>
      %65 = arith.addf %62, %64 : vector<128x64xf32>
      %cst_44 = arith.constant 0.000000e+00 : f32
      %66 = vector.broadcast %cst_44 : f32 to vector<128x64xf32>
      %67 = arith.cmpf ogt, %65, %66 : vector<128x64xf32>
      %cst_45 = arith.constant 2.000000e-01 : f32
      %68 = vector.broadcast %cst_45 : f32 to vector<128x64xf32>
      %69 = arith.mulf %68, %65 : vector<128x64xf32>
      %70 = arith.select %67, %65, %69 : vector<128x64xi1>, vector<128x64xf32>
      %71 = arith.truncf %70 : vector<128x64xf32> to vector<128x64xbf16>
      %c0_46 = arith.constant 0 : index
      %c0_47 = arith.constant 0 : index
      %72 = vector.load %arg13[%c0_46, %c0_47] : memref<64x12xbf16, #tpu.memory_space<vmem>>, vector<64x12xbf16>
      %cst_48 = arith.constant dense<0.000000e+00> : vector<128x12xf32>
      %73 = tpu.matmul %71, %72, %cst_48 {dimension_numbers = #tpu.dot_dimension_numbers<[1], [0], [0], [1], [0, 0, 1, 1], [], []>} : vector<128x64xbf16>, vector<64x12xbf16>, vector<128x12xf32> -> vector<128x12xf32>
      %c0_49 = arith.constant 0 : index
      %c0_50 = arith.constant 0 : index
      %74 = vector.load %arg14[%c0_49, %c0_50] : memref<1x12xf32, #tpu.memory_space<vmem>>, vector<1x12xf32>
      %75 = vector.broadcast %74 : vector<1x12xf32> to vector<128x12xf32>
      %76 = arith.addf %73, %75 : vector<128x12xf32>
      %c0_51 = arith.constant 0 : index
      %c0_52 = arith.constant 0 : index
      %c0_53 = arith.constant 0 : index
      %77 = vector.load %arg15[%c0_51, %c0_52, %c0_53] : memref<1x128x12xf32, #tpu.memory_space<vmem>>, vector<1x128x12xf32>
      %78 = vector.shape_cast %77 : vector<1x128x12xf32> to vector<128x12xf32>
      %79 = vector.shape_cast %76 : vector<128x12xf32> to vector<1x128x12xf32>
      tpu.vector_store %arg15[%c0_51, %c0_52, %c0_53], %79 {strides = array<i32>} : memref<1x128x12xf32, #tpu.memory_space<vmem>>, vector<1x128x12xf32>,
    } else {
    }
    return
  }
  func.func @transform_0(%arg0: i32, %arg1: i32, %arg2: i32) -> (i32, i32, i32) {
    %c0_i32 = arith.constant 0 : i32
    %c0_i32_0 = arith.constant 0 : i32
    return %arg0, %arg1, %c0_i32 : i32, i32, i32
  }
  func.func @transform_1(%arg0: i32, %arg1: i32, %arg2: i32) -> (i32, i32, i32) {
    %c0_i32 = arith.constant 0 : i32
    %c0_i32_0 = arith.constant 0 : i32
    return %arg0, %arg2, %c0_i32 : i32, i32, i32
  }
  func.func @transform_2(%arg0: i32, %arg1: i32, %arg2: i32) -> (i32, i32) {
    %c0_i32 = arith.constant 0 : i32
    %c0_i32_0 = arith.constant 0 : i32
    %c0_i32_1 = arith.constant 0 : i32
    return %c0_i32, %c0_i32_0 : i32, i32
  }
  func.func @transform_3(%arg0: i32, %arg1: i32, %arg2: i32) -> (i32, i32) {
    %c0_i32 = arith.constant 0 : i32
    %c0_i32_0 = arith.constant 0 : i32
    %c0_i32_1 = arith.constant 0 : i32
    return %c0_i32, %c0_i32_0 : i32, i32
  }
  func.func @transform_4(%arg0: i32, %arg1: i32, %arg2: i32) -> (i32, i32) {
    %c0_i32 = arith.constant 0 : i32
    %c0_i32_0 = arith.constant 0 : i32
    %c0_i32_1 = arith.constant 0 : i32
    return %c0_i32, %c0_i32_0 : i32, i32
  }
  func.func @transform_5(%arg0: i32, %arg1: i32, %arg2: i32) -> (i32, i32) {
    %c0_i32 = arith.constant 0 : i32
    %c0_i32_0 = arith.constant 0 : i32
    %c0_i32_1 = arith.constant 0 : i32
    return %c0_i32, %c0_i32_0 : i32, i32
  }
  func.func @transform_6(%arg0: i32, %arg1: i32, %arg2: i32) -> (i32, i32) {
    %c0_i32 = arith.constant 0 : i32
    %c0_i32_0 = arith.constant 0 : i32
    %c0_i32_1 = arith.constant 0 : i32
    return %c0_i32, %c0_i32_0 : i32, i32
  }
  func.func @transform_7(%arg0: i32, %arg1: i32, %arg2: i32) -> (i32, i32) {
    %c0_i32 = arith.constant 0 : i32
    %c0_i32_0 = arith.constant 0 : i32
    %c0_i32_1 = arith.constant 0 : i32
    return %c0_i32, %c0_i32_0 : i32, i32
  }
  func.func @transform_8(%arg0: i32, %arg1: i32, %arg2: i32) -> (i32, i32) {
    %c0_i32 = arith.constant 0 : i32
    %c0_i32_0 = arith.constant 0 : i32
    %c0_i32_1 = arith.constant 0 : i32
    return %c0_i32, %c0_i32_0 : i32, i32
  }
  func.func @transform_9(%arg0: i32, %arg1: i32, %arg2: i32) -> (i32, i32) {
    %c0_i32 = arith.constant 0 : i32
    %c0_i32_0 = arith.constant 0 : i32
    %c0_i32_1 = arith.constant 0 : i32
    return %c0_i32, %c0_i32_0 : i32, i32
  }
  func.func @transform_10(%arg0: i32, %arg1: i32, %arg2: i32) -> (i32, i32) {
    %c0_i32 = arith.constant 0 : i32
    %c0_i32_0 = arith.constant 0 : i32
    %c0_i32_1 = arith.constant 0 : i32
    return %c0_i32, %c0_i32_0 : i32, i32
  }
  func.func @transform_11(%arg0: i32, %arg1: i32, %arg2: i32) -> (i32, i32) {
    %c0_i32 = arith.constant 0 : i32
    %c0_i32_0 = arith.constant 0 : i32
    %c0_i32_1 = arith.constant 0 : i32
    return %c0_i32, %c0_i32_0 : i32, i32
  }
  func.func @transform_12(%arg0: i32, %arg1: i32, %arg2: i32) -> (i32, i32, i32) {
    %c0_i32 = arith.constant 0 : i32
    %c0_i32_0 = arith.constant 0 : i32
    return %arg0, %arg1, %c0_i32 : i32, i32, i32
  }
}

</mosaic_0001>

<bundles_post_ra>
// kernel: pc_mlp_forward.1
= control target key start
LH: loop header
LB: loop body
LE: loop exit
PB: predicated region body
PF: predicated region fallthrough
CT: control target
= control target key end

     0   :  { %s3000_s21 = smov 0   ;;  %s3002_s22 = smov 0   ;;  %s3894_s0 = inlined_call_operand.vmem [shape: f32[2,256,24], index: 0, kind: input, shape index: {}, may-alias: {0,1}]   ;;  %s3895_s1 = inlined_call_operand.vmem [shape: f32[2,256,24], index: 1, kind: input, shape index: {}, may-alias: {0,1}]   ;;  %s3896_s2 = inlined_call_operand.vmem [shape: f32[24,32], index: 2, kind: input, shape index: {}]   ;;  %s3897_s3 = inlined_call_operand.vmem [shape: f32[1,32], index: 3, kind: input, shape index: {}]   ;;  %s3898_s4 = inlined_call_operand.vmem [shape: bf16[32,64], index: 4, kind: input, shape index: {}]   ;;  %s3899_s5 = inlined_call_operand.vmem [shape: f32[1,64], index: 5, kind: input, shape index: {}]   ;;  %s3900_s6 = inlined_call_operand.vmem [shape: bf16[32,96], index: 6, kind: input, shape index: {}]   ;;  %s3901_s7 = inlined_call_operand.vmem [shape: f32[1,96], index: 7, kind: input, shape index: {}]   ;;  %s3902_s8 = inlined_call_operand.vmem [shape: bf16[32,64], index: 8, kind: input, shape index: {}]   ;;  %s3903_s9 = inlined_call_operand.vmem [shape: f32[1,64], index: 9, kind: input, shape index: {}]   ;;  %s3904_s10 = inlined_call_operand.vmem [shape: bf16[64,12], index: 10, kind: input, shape index: {}]   ;;  %s3905_s11 = inlined_call_operand.vmem [shape: f32[1,12], index: 11, kind: input, shape index: {}]   ;;  %s3906_s12 = inlined_call_operand.vmem [shape: f32[2,256,12], index: 12, kind: output, shape index: {}]  }
   0x1   :  { %s3004_s23 = smov 0   ;;  %s3006_s24 = smov 0  }
   0x2   :  { %s3008_s25 = smov 0   ;;  %s3010_s26 = smov 0  }
   0x3   :  { %s3012_s27 = smov 0  }
   0x4 LB: > { %3910 = sst [smem:[#allocation7_spill]] %s2916_s24  ;;  %s34_s28 = sadd.s32 1, %s2916_s24  ;;  %s2928_s27 = sphi %s3012_s27, %s22_s27   ;;  %s2924_s26 = sphi %s3010_s26, %s3922_s26   ;;  %s2920_s25 = sphi %s3008_s25, %s3921_s25   ;;  %s2916_s24 = sphi %s3006_s24, %s3920_s24   ;;  %s2912_s23 = sphi %s3004_s23, %s3919_s23   ;;  %s2908_s22 = sphi %s3002_s22, %s3918_s22   ;;  %s2904_s21 = sphi %s3000_s21, %s3917_s21  }
   0x5   : > { %3911 = sst [smem:[#allocation8_spill]] %s2920_s25  ;;  %p35_p0 = scmp.ge.s32.totalorder %s34_s28, 2 }
   0x6   : > { %3912 = sst [smem:[#allocation9_spill]] %s2924_s26  ;;  %s37_s29 = sadd.s32 1, %s2920_s25 }
   0x7   : > { %p2502_p1 = scmp.ge.s32.totalorder %s2928_s27, 1  ;;  %p407_p2 = scmp.lt.s32.totalorder %s2928_s27, 9 }
   0x8   : > { %s3924_s28 = smov (%p35_p0, %s34_s28), 0  ;;  %s3926_s29 = smov (!%p35_p0, %s37_s29), %s2920_s25 }
   0x9   : > { %3913 = sst [smem:[#allocation10_spill]] %s3924_s28  ;;  %p408_p3 = pnand %p2502_p1, %p407_p2 }
   0xa   : > { %p39_p4 = scmp.ge.s32.totalorder %s3926_s29, 2  ;;  %s41_s30 = sadd.s32 1, %s2924_s26 }
   0xb   : > { %s2503_s13 = sshll.u32 (!%p408_p3), %s2908_s22, 4  ;;  %p467_p6 = scmp.lt.s32.totalorder (!%p408_p3), %s2912_s23, 1 }
   0xc   : > { %s3928_s29 = smov (%p39_p4, %s3926_s29), 0  ;;  %s3930_s30 = smov (!%p39_p4, %s41_s30), %s2924_s26 }
   0xd   : > { %3914 = sst [smem:[#allocation11_spill]] %s3928_s29  ;;  %p43_p5 = scmp.ge.s32.totalorder %s3930_s30, 2 }
   0xe   : > { %411 = sbr.rel (%p408_p3) target bundleno = 2167 (0x877), region = 68  ;;  %p469_p7 = scmp.lt.s32.totalorder (!%p408_p3), %s2503_s13, 31 }
   0xf   : > { %s3932_s30 = smov (%p43_p5, %s3930_s30), 0  ;;  %s2506_s14 = sshll.u32 (!%p408_p3), %s2904_s21, 4 }
  0x10   : > { %3915 = sst [smem:[#allocation12_spill]] %s3932_s30  ;;  %p479_p8 = scmp.lt.s32.totalorder (!%p408_p3), %s2506_s14, 31 }
  0x11   : > { %p2512_p9 = scmp.ne.s32.totalorder (!%p408_p3), %s2904_s21, 0 }
  0x13   : > { %s3934_s23 = smov (!%p467_p6, %s2912_s23), 1  ;;  %s3936_s13 = smov (!%p469_p7, %s2503_s13), 31 }
  0x14   : > { %s2504_s15 = sshll.u32 %s3934_s23, 5  ;;  %s3938_s14 = smov (!%p479_p8, %s2506_s14), 31 }
  0x15   : > { %s472_s16 = sadd.s32 %s2504_s15, %s3936_s13  ;;  %s482_s22 = sadd.s32 %s2504_s15, %s3938_s14 }
  0x16   : > { %s2505_s17 = sshll.u32 %s472_s16, 3  ;;  %s2508_s26 = sshll.u32 %s482_s22, 3 }
  0x17   : > { %s3048_s20 = scalar_lea.vmem %s3894_s0, %s2505_s17  ;;  %s3053_s30 = scalar_lea.vmem %s3906_s12, %s2505_s17 }
  0x18   : > { %s3058_s23 = scalar_lea.vmem %s3895_s1, %s2508_s26  ;;  %500 = sbr.rel (%p2512_p9) target bundleno = 425 (0x1a9), region = 72 }
  0x1d   : > { %v519_v0 = vld [vmem:[%s3896_s2 + $0x10] sm:$0xff]  ;;  %v518_v1 = vld [vmem:[%s3896_s2 + $0x8] sm:$0xff]  ;;  %v517_v2 = vld [vmem:[%s3896_s2] sm:$0xff]  ;;  %vm524_vm0 = vcmask 195584   ;;  %vm837_vm1 = vcmask 7168   ;;  %v2930_v21 = vmov -inf  }
  0x1e   : > { %586 = vmatpush.msra.mxu0 %v519_v0  ;;  %2678 = vmatpush.msra.mxu3 %v519_v0  ;;  %v501_v3 = vld [vmem:[%s3048_s20] sm:$0xff]  ;;  %v502_v4 = vld [vmem:[%s3048_s20 + $0x8] sm:$0xff]  ;;  %v503_v5 = vld [vmem:[%s3048_s20 + $0x10] sm:$0xff]  ;;  %838 = vst.msk [vmem:[#allocation4] sm:$0xff] %vm837_vm1, %v2930_v21  ;;  %vm686_vm3 = vcmask 261120   ;;  %v2931_v26 = vmov 0.0  }
  0x1f   : > { %v510_v6 = vld [vmem:[%s3048_s20 + $0x48] sm:$0xff]  ;;  %v504_v7 = vld [vmem:[%s3048_s20 + $0x18] sm:$0xff]  ;;  %v511_v8 = vld [vmem:[%s3048_s20 + $0x50] sm:$0xff]  ;;  %839 = vst.msk [vmem:[#allocation4 + $0x8] sm:$0xff] %vm837_vm1, %v2930_v21 }
  0x20   : > { %587 = vmatpush.msra.mxu0 %v518_v1  ;;  %2679 = vmatpush.msra.mxu3 %v518_v1  ;;  %v505_v9 = vld [vmem:[%s3048_s20 + $0x20] sm:$0xff]  ;;  %v512_v10 = vld [vmem:[%s3048_s20 + $0x58] sm:$0xff]  ;;  %v506_v11 = vld [vmem:[%s3048_s20 + $0x28] sm:$0xff]  ;;  %840 = vst.msk [vmem:[#allocation4 + $0x10] sm:$0xff] %vm837_vm1, %v2930_v21 }
  0x21   : > { %v513_v12 = vld [vmem:[%s3048_s20 + $0x60] sm:$0xff]  ;;  %v507_v13 = vld [vmem:[%s3048_s20 + $0x30] sm:$0xff]  ;;  %v514_v14 = vld [vmem:[%s3048_s20 + $0x68] sm:$0xff]  ;;  %841 = vst.msk [vmem:[#allocation4 + $0x18] sm:$0xff] %vm837_vm1, %v2930_v21 }
  0x22   : > { %588 = vmatpush.msra.mxu0 %v517_v2  ;;  %2680 = vmatpush.msra.mxu3 %v517_v2  ;;  %v508_v15 = vld [vmem:[%s3048_s20 + $0x38] sm:$0xff]  ;;  %v515_v16 = vld [vmem:[%s3048_s20 + $0x70] sm:$0xff]  ;;  %v509_v17 = vld [vmem:[%s3048_s20 + $0x40] sm:$0xff]  ;;  %842 = vst.msk [vmem:[#allocation4 + $0x20] sm:$0xff] %vm837_vm1, %v2930_v21 }
  0x23   : > { %2513 = vmatmul.msk.f32.vlgmr.msra.gmra.mxu0 %vm524_vm0, %v501_v3  ;;  %2522 = vmatmul.msk.f32.vlgmr.msra.gmra.mxu3 %vm524_vm0, %v510_v6  ;;  %v516_v18 = vld [vmem:[%s3048_s20 + $0x78] sm:$0xff]  ;;  %v2661_v19 = vld [vmem:[%s3898_s4 + $0x8] sm:$0xff]  ;;  %v2660_v20 = vld [vmem:[%s3898_s4] sm:$0xff]  ;;  %843 = vst.msk [vmem:[#allocation4 + $0x28] sm:$0xff] %vm837_vm1, %v2930_v21 }
  0x24   : > { %761 = vmatpush.bf16.msra.mxu1 %v2661_v19  ;;  %2681 = vmatpush.bf16.msra.mxu2 %v2661_v19  ;;  %844 = vst.msk [vmem:[#allocation4 + $0x30] sm:$0xff] %vm837_vm1, %v2930_v21  ;;  %v3120_v22 = vld [vmem:[%s3897_s3] ss:$0 sm:$0xff] }
  0x25   : > { %845 = vst.msk [vmem:[#allocation4 + $0x38] sm:$0xff] %vm837_vm1, %v2930_v21 }
  0x26   : > { %846 = vst.msk [vmem:[#allocation4 + $0x40] sm:$0xff] %vm837_vm1, %v2930_v21 }
  0x27   : > { %847 = vst.msk [vmem:[#allocation4 + $0x48] sm:$0xff] %vm837_vm1, %v2930_v21 }
  0x28   : > { %762 = vmatpush.bf16.msra.mxu1 %v2660_v20  ;;  %2682 = vmatpush.bf16.msra.mxu2 %v2660_v20  ;;  %848 = vst.msk [vmem:[#allocation4 + $0x50] sm:$0xff] %vm837_vm1, %v2930_v21 }
  0x29   : > { %849 = vst.msk [vmem:[#allocation4 + $0x58] sm:$0xff] %vm837_vm1, %v2930_v21 }
  0x2a   : > { %850 = vst.msk [vmem:[#allocation4 + $0x60] sm:$0xff] %vm837_vm1, %v2930_v21 }
  0x2b   : > { %2514 = vmatmul.msk.f32.gmra.mxu0 %vm524_vm0, %v502_v4  ;;  %2523 = vmatmul.msk.f32.gmra.mxu3 %vm524_vm0, %v511_v8  ;;  %851 = vst.msk [vmem:[#allocation4 + $0x68] sm:$0xff] %vm837_vm1, %v2930_v21 }
  0x2c   : > { %852 = vst.msk [vmem:[#allocation4 + $0x70] sm:$0xff] %vm837_vm1, %v2930_v21 }
  0x2d   : > { %853 = vst.msk [vmem:[#allocation4 + $0x78] sm:$0xff] %vm837_vm1, %v2930_v21 }
  0x2e   : > { %854 = vst.msk [vmem:[#allocation5] sm:$0xff] %vm837_vm1, %v2931_v26 }
  0x2f   : > { %855 = vst.msk [vmem:[#allocation5 + $0x8] sm:$0xff] %vm837_vm1, %v2931_v26 }
  0x30   : > { %856 = vst.msk [vmem:[#allocation5 + $0x10] sm:$0xff] %vm837_vm1, %v2931_v26 }
  0x31   : > { %857 = vst.msk [vmem:[#allocation5 + $0x18] sm:$0xff] %vm837_vm1, %v2931_v26 }
  0x32   : > { %858 = vst.msk [vmem:[#allocation5 + $0x20] sm:$0xff] %vm837_vm1, %v2931_v26 }
  0x33   : > { %2515 = vmatmul.msk.f32.gmra.mxu0 %vm524_vm0, %v503_v5  ;;  %2524 = vmatmul.msk.f32.gmra.mxu3 %vm524_vm0, %v512_v10  ;;  %859 = vst.msk [vmem:[#allocation5 + $0x28] sm:$0xff] %vm837_vm1, %v2931_v26 }
  0x34   : > { %860 = vst.msk [vmem:[#allocation5 + $0x30] sm:$0xff] %vm837_vm1, %v2931_v26 }
  0x35   : > { %861 = vst.msk [vmem:[#allocation5 + $0x38] sm:$0xff] %vm837_vm1, %v2931_v26 }
  0x36   : > { %862 = vst.msk [vmem:[#allocation5 + $0x40] sm:$0xff] %vm837_vm1, %v2931_v26 }
  0x37   : > { %863 = vst.msk [vmem:[#allocation5 + $0x48] sm:$0xff] %vm837_vm1, %v2931_v26 }
  0x38   : > { %864 = vst.msk [vmem:[#allocation5 + $0x50] sm:$0xff] %vm837_vm1, %v2931_v26 }
  0x39   : > { %865 = vst.msk [vmem:[#allocation5 + $0x58] sm:$0xff] %vm837_vm1, %v2931_v26 }
  0x3a   : > { %866 = vst.msk [vmem:[#allocation5 + $0x60] sm:$0xff] %vm837_vm1, %v2931_v26 }
  0x3b   : > { %2516 = vmatmul.msk.f32.gmra.mxu0 %vm524_vm0, %v504_v7  ;;  %2525 = vmatmul.msk.f32.gmra.mxu3 %vm524_vm0, %v513_v12  ;;  %867 = vst.msk [vmem:[#allocation5 + $0x68] sm:$0xff] %vm837_vm1, %v2931_v26 }
  0x3c   : > { %868 = vst.msk [vmem:[#allocation5 + $0x70] sm:$0xff] %vm837_vm1, %v2931_v26 }
  0x3d   : > { %869 = vst.msk [vmem:[#allocation5 + $0x78] sm:$0xff] %vm837_vm1, %v2931_v26 }
  0x3e   : > { %870 = vst.msk [vmem:[#allocation6] sm:$0xff] %vm686_vm3, %v2931_v26 }
  0x3f   : > { %871 = vst.msk [vmem:[#allocation6 + $0x8] sm:$0xff] %vm686_vm3, %v2931_v26 }
  0x40   : > { %872 = vst.msk [vmem:[#allocation6 + $0x10] sm:$0xff] %vm686_vm3, %v2931_v26 }
  0x41   : > { %873 = vst.msk [vmem:[#allocation6 + $0x18] sm:$0xff] %vm686_vm3, %v2931_v26 }
  0x42   : > { %874 = vst.msk [vmem:[#allocation6 + $0x20] sm:$0xff] %vm686_vm3, %v2931_v26 }
  0x43   : > { %2517 = vmatmul.msk.f32.gmra.mxu0 %vm524_vm0, %v505_v9  ;;  %2526 = vmatmul.msk.f32.gmra.mxu3 %vm524_vm0, %v514_v14  ;;  %875 = vst.msk [vmem:[#allocation6 + $0x28] sm:$0xff] %vm686_vm3, %v2931_v26 }
  0x44   : > { %876 = vst.msk [vmem:[#allocation6 + $0x30] sm:$0xff] %vm686_vm3, %v2931_v26 }
  0x45   : > { %877 = vst.msk [vmem:[#allocation6 + $0x38] sm:$0xff] %vm686_vm3, %v2931_v26 }
  0x46   : > { %878 = vst.msk [vmem:[#allocation6 + $0x40] sm:$0xff] %vm686_vm3, %v2931_v26 }
  0x47   : > { %879 = vst.msk [vmem:[#allocation6 + $0x48] sm:$0xff] %vm686_vm3, %v2931_v26 }
  0x48   : > { %880 = vst.msk [vmem:[#allocation6 + $0x50] sm:$0xff] %vm686_vm3, %v2931_v26 }
  0x49   : > { %881 = vst.msk [vmem:[#allocation6 + $0x58] sm:$0xff] %vm686_vm3, %v2931_v26 }
  0x4a   : > { %882 = vst.msk [vmem:[#allocation6 + $0x60] sm:$0xff] %vm686_vm3, %v2931_v26 }
  0x4b   : > { %2518 = vmatmul.msk.f32.gmra.mxu0 %vm524_vm0, %v506_v11  ;;  %2527 = vmatmul.msk.f32.gmra.mxu3 %vm524_vm0, %v515_v16  ;;  %883 = vst.msk [vmem:[#allocation6 + $0x68] sm:$0xff] %vm686_vm3, %v2931_v26 }
  0x4c   : > { %884 = vst.msk [vmem:[#allocation6 + $0x70] sm:$0xff] %vm686_vm3, %v2931_v26 }
  0x4d   : > { %885 = vst.msk [vmem:[#allocation6 + $0x78] sm:$0xff] %vm686_vm3, %v2931_v26 }
  0x53   : > { %2519 = vmatmul.msk.f32.gmra.mxu0 %vm524_vm0, %v507_v13  ;;  %2528 = vmatmul.msk.f32.gmra.mxu3 %vm524_vm0, %v516_v18 }
  0x5b   : > { %2520 = vmatmul.msk.f32.gmra.mxu0 %vm524_vm0, %v508_v15 }
  0x63   : > { %2521 = vmatmul.msk.f32.gmra.mxu0 %vm524_vm0, %v509_v17 }
  0xa0   : > { %v590_v23 = vpop.f32.mrf.mxu0 }
  0xa1   : > { %v591_v24 = vadd.f32 %v3120_v22, %v590_v23 }
  0xa3   : > { %vm638_vm2 = vcmp.gt.f32.partialorder %v591_v24, 0.0  ;;  %v654_v25 = vmul.f32 0.2, %v591_v24 }
  0xa5   : > { %v670_v27 = vsel %vm638_vm2, %v591_v24, %v654_v25 }
  0xa6   : > { %687 = vst.msk [vmem:[#allocation2] sm:$0xff] %vm686_vm3, %v670_v27  ;;  %v617_v35 = vpop.f32.mrf.mxu3 }
  0xa7   : > { %v618_v43 = vadd.f32 %v3120_v22, %v617_v35 }
  0xa8   : > { %v593_v28 = vpop.f32.mrf.mxu0 }
  0xa9   : > { %v594_v29 = vadd.f32 %v3120_v22, %v593_v28  ;;  %v663_v48 = vmul.f32 0.2, %v618_v43  ;;  %vm647_vm8 = vcmp.gt.f32.partialorder %v618_v43, 0.0 }
  0xab   : > { %vm639_vm4 = vcmp.gt.f32.partialorder %v594_v29, 0.0  ;;  %v655_v30 = vmul.f32 0.2, %v594_v29  ;;  %v679_v53 = vsel %vm647_vm8, %v618_v43, %v663_v48 }
  0xac   : > { %696 = vst.msk [vmem:[#allocation2 + $0x48] sm:$0xff] %vm686_vm3, %v679_v53 }
  0xad   : > { %v671_v31 = vsel %vm639_vm4, %v594_v29, %v655_v30  ;;  %vm820_vm4 = vcmask 519168  }
  0xae   : > { %688 = vst.msk [vmem:[#allocation2 + $0x8] sm:$0xff] %vm686_vm3, %v671_v31  ;;  %v703_v32 = vpack.c.bf16 %v671_v31, %v670_v27  ;;  %v620_v44 = vpop.f32.mrf.mxu3 }
  0xaf   : > { %v621_v46 = vadd.f32 %v3120_v22, %v620_v44 }
  0xb0   : > { %v596_v33 = vpop.f32.mrf.mxu0  ;;  %2537 = vmatmul.msk.bf16.vlgmr.msra.gmra.mxu1 %vm686_vm3, %v703_v32 }
  0xb1   : > { %v597_v34 = vadd.f32 %v3120_v22, %v596_v33  ;;  %v664_v50 = vmul.f32 0.2, %v621_v46  ;;  %vm648_vm9 = vcmp.gt.f32.partialorder %v621_v46, 0.0 }
  0xb3   : > { %v656_v37 = vmul.f32 0.2, %v597_v34  ;;  %vm640_vm5 = vcmp.gt.f32.partialorder %v597_v34, 0.0  ;;  %v680_v56 = vsel %vm648_vm9, %v621_v46, %v664_v50 }
  0xb4   : > { %697 = vst.msk [vmem:[#allocation2 + $0x50] sm:$0xff] %vm686_vm3, %v680_v56 }
  0xb5   : > { %v672_v40 = vsel %vm640_vm5, %v597_v34, %v656_v37 }
  0xb6   : > { %689 = vst.msk [vmem:[#allocation2 + $0x10] sm:$0xff] %vm686_vm3, %v672_v40  ;;  %v623_v52 = vpop.f32.mrf.mxu3 }
  0xb7   : > { %v624_v54 = vadd.f32 %v3120_v22, %v623_v52 }
  0xb8   : > { %v599_v36 = vpop.f32.mrf.mxu0 }
  0xb9   : > { %v600_v38 = vadd.f32 %v3120_v22, %v599_v36  ;;  %vm649_vm10 = vcmp.gt.f32.partialorder %v624_v54, 0.0  ;;  %v665_v58 = vmul.f32 0.2, %v624_v54 }
  0xbb   : > { %vm641_vm6 = vcmp.gt.f32.partialorder %v600_v38, 0.0  ;;  %v657_v39 = vmul.f32 0.2, %v600_v38  ;;  %v681_v60 = vsel %vm649_vm10, %v624_v54, %v665_v58 }
  0xbc   : > { %698 = vst.msk [vmem:[#allocation2 + $0x58] sm:$0xff] %vm686_vm3, %v681_v60  ;;  %v708_v30 = vpack.c.bf16 %v681_v60, %v680_v56 }
  0xbd   : > { %v673_v41 = vsel %vm641_vm6, %v600_v38, %v657_v39 }
  0xbe   : > { %v704_v42 = vpack.c.bf16 %v673_v41, %v672_v40  ;;  %690 = vst.msk [vmem:[#allocation2 + $0x18] sm:$0xff] %vm686_vm3, %v673_v41  ;;  %v626_v63 = vpop.f32.mrf.mxu3 }
  0xbf   : > { %v627_v1 = vadd.f32 %v3120_v22, %v626_v63 }
  0xc0   : > { %v602_v45 = vpop.f32.mrf.mxu0  ;;  %2538 = vmatmul.msk.bf16.gmra.mxu1 %vm686_vm3, %v704_v42 }
  0xc1   : > { %v603_v47 = vadd.f32 %v3120_v22, %v602_v45  ;;  %v666_v4 = vmul.f32 0.2, %v627_v1  ;;  %vm650_vm13 = vcmp.gt.f32.partialorder %v627_v1, 0.0 }
  0xc3   : > { %vm642_vm7 = vcmp.gt.f32.partialorder %v603_v47, 0.0  ;;  %v658_v49 = vmul.f32 0.2, %v603_v47  ;;  %v682_v9 = vsel %vm650_vm13, %v627_v1, %v666_v4 }
  0xc4   : > { %699 = vst.msk [vmem:[#allocation2 + $0x60] sm:$0xff] %vm686_vm3, %v682_v9 }
  0xc5   : > { %v674_v51 = vsel %vm642_vm7, %v603_v47, %v658_v49 }
  0xc6   : > { %691 = vst.msk [vmem:[#allocation2 + $0x20] sm:$0xff] %vm686_vm3, %v674_v51  ;;  %v629_v6 = vpop.f32.mrf.mxu3 }
  0xc7   : > { %v630_v7 = vadd.f32 %v3120_v22, %v629_v6 }
  0xc8   : > { %v605_v55 = vpop.f32.mrf.mxu0 }
  0xc9   : > { %v606_v57 = vadd.f32 %v3120_v22, %v605_v55  ;;  %vm651_vm14 = vcmp.gt.f32.partialorder %v630_v7, 0.0  ;;  %v667_v11 = vmul.f32 0.2, %v630_v7 }
  0xcb   : > { %vm643_vm11 = vcmp.gt.f32.partialorder %v606_v57, 0.0  ;;  %v659_v59 = vmul.f32 0.2, %v606_v57  ;;  %v683_v13 = vsel %vm651_vm14, %v630_v7, %v667_v11 }
  0xcc   : > { %700 = vst.msk [vmem:[#allocation2 + $0x68] sm:$0xff] %vm686_vm3, %v683_v13  ;;  %v709_v31 = vpack.c.bf16 %v683_v13, %v682_v9 }
  0xcd   : > { %v675_v61 = vsel %vm643_vm11, %v606_v57, %v659_v59 }
  0xce   : > { %692 = vst.msk [vmem:[#allocation2 + $0x28] sm:$0xff] %vm686_vm3, %v675_v61  ;;  %v705_v62 = vpack.c.bf16 %v675_v61, %v674_v51  ;;  %v632_v16 = vpop.f32.mrf.mxu3 }
  0xcf   : > { %v633_v18 = vadd.f32 %v3120_v22, %v632_v16 }
  0xd0   : > { %v608_v0 = vpop.f32.mrf.mxu0  ;;  %2539 = vmatmul.msk.bf16.gmra.mxu1 %vm686_vm3, %v705_v62 }
  0xd1   : > { %v609_v2 = vadd.f32 %v3120_v22, %v608_v0  ;;  %v668_v21 = vmul.f32 0.2, %v633_v18  ;;  %vm652_vm1 = vcmp.gt.f32.partialorder %v633_v18, 0.0 }
  0xd3   : > { %vm644_vm12 = vcmp.gt.f32.partialorder %v609_v2, 0.0  ;;  %v660_v3 = vmul.f32 0.2, %v609_v2  ;;  %v684_v27 = vsel %vm652_vm1, %v633_v18, %v668_v21 }
  0xd4   : > { %701 = vst.msk [vmem:[#allocation2 + $0x70] sm:$0xff] %vm686_vm3, %v684_v27 }
  0xd5   : > { %v676_v5 = vsel %vm644_vm12, %v609_v2, %v660_v3 }
  0xd6   : > { %693 = vst.msk [vmem:[#allocation2 + $0x30] sm:$0xff] %vm686_vm3, %v676_v5  ;;  %v635_v25 = vpop.f32.mrf.mxu3 }
  0xd7   : > { %v636_v26 = vadd.f32 %v3120_v22, %v635_v25 }
  0xd8   : > { %v611_v8 = vpop.f32.mrf.mxu0 }
  0xd9   : > { %v612_v10 = vadd.f32 %v3120_v22, %v611_v8  ;;  %vm653_vm2 = vcmp.gt.f32.partialorder %v636_v26, 0.0  ;;  %v669_v28 = vmul.f32 0.2, %v636_v26 }
  0xdb   : > { %vm645_vm15 = vcmp.gt.f32.partialorder %v612_v10, 0.0  ;;  %v661_v12 = vmul.f32 0.2, %v612_v10  ;;  %v685_v29 = vsel %vm653_vm2, %v636_v26, %v669_v28 }
  0xdc   : > { %702 = vst.msk [vmem:[#allocation2 + $0x78] sm:$0xff] %vm686_vm3, %v685_v29  ;;  %v710_v32 = vpack.c.bf16 %v685_v29, %v684_v27 }
  0xdd   : > { %v677_v14 = vsel %vm645_vm15, %v612_v10, %v661_v12 }
  0xde   : > { %694 = vst.msk [vmem:[#allocation2 + $0x38] sm:$0xff] %vm686_vm3, %v677_v14  ;;  %v706_v15 = vpack.c.bf16 %v677_v14, %v676_v5 }
  0xe0   : > { %v614_v17 = vpop.f32.mrf.mxu0  ;;  %2540 = vmatmul.msk.bf16.gmra.mxu1 %vm686_vm3, %v706_v15 }
  0xe1   : > { %v615_v19 = vadd.f32 %v3120_v22, %v614_v17  ;;  %v3236_v22 = vld [vmem:[%s3899_s5] ss:$0 sm:$0xff] }
  0xe3   : > { %vm646_vm0 = vcmp.gt.f32.partialorder %v615_v19, 0.0  ;;  %v662_v20 = vmul.f32 0.2, %v615_v19 }
  0xe5   : > { %v678_v23 = vsel %vm646_vm0, %v615_v19, %v662_v20 }
  0xe6   : > { %695 = vst.msk [vmem:[#allocation2 + $0x40] sm:$0xff] %vm686_vm3, %v678_v23  ;;  %v707_v24 = vpack.c.bf16 %v679_v53, %v678_v23 }
  0xe8   : > { %2541 = vmatmul.msk.bf16.vlgmr.msra.gmra.mxu2 %vm686_vm3, %v707_v24 }
  0xf8   : > { %2542 = vmatmul.msk.bf16.gmra.mxu2 %vm686_vm3, %v708_v30 }
 0x108   : > { %2543 = vmatmul.msk.bf16.gmra.mxu2 %vm686_vm3, %v709_v31 }
 0x118   : > { %2544 = vmatmul.msk.bf16.gmra.mxu2 %vm686_vm3, %v710_v32 }
 0x12d   : > { %v764_v33 = vpop.f32.mrf.mxu1 }
 0x12e   : > { %v765_v34 = vadd.f32 %v3236_v22, %v764_v33 }
 0x130   : > { %v804_v35 = vpack.c.bf16 %v765_v34, %v765_v34 }
 0x132   : > { %821 = vst.msk [vmem:[#allocation3] sm:$0xf] %vm820_vm4, %v804_v35 }
 0x135   : > { %v766_v36 = vpop.f32.mrf.mxu1 }
 0x136   : > { %v767_v37 = vadd.f32 %v3236_v22, %v766_v36 }
 0x138   : > { %v805_v38 = vpack.c.bf16 %v767_v37, %v767_v37 }
 0x13a   : > { %822 = vst.msk [vmem:[#allocation3 + $0x4] sm:$0xf] %vm820_vm4, %v805_v38 }
 0x13d   : > { %v769_v39 = vpop.f32.mrf.mxu1 }
 0x13e   : > { %v770_v40 = vadd.f32 %v3236_v22, %v769_v39 }
 0x140   : > { %v806_v41 = vpack.c.bf16 %v770_v40, %v770_v40 }
 0x142   : > { %823 = vst.msk [vmem:[#allocation3 + $0x8] sm:$0xf] %vm820_vm4, %v806_v41 }
 0x145   : > { %v771_v42 = vpop.f32.mrf.mxu1 }
 0x146   : > { %v772_v43 = vadd.f32 %v3236_v22, %v771_v42 }
 0x148   : > { %v807_v44 = vpack.c.bf16 %v772_v43, %v772_v43 }
 0x14a   : > { %824 = vst.msk [vmem:[#allocation3 + $0xc] sm:$0xf] %vm820_vm4, %v807_v44 }
 0x14d   : > { %v774_v45 = vpop.f32.mrf.mxu1 }
 0x14e   : > { %v775_v46 = vadd.f32 %v3236_v22, %v774_v45 }
 0x150   : > { %v808_v47 = vpack.c.bf16 %v775_v46, %v775_v46 }
 0x152   : > { %825 = vst.msk [vmem:[#allocation3 + $0x10] sm:$0xf] %vm820_vm4, %v808_v47 }
 0x155   : > { %v776_v48 = vpop.f32.mrf.mxu1 }
 0x156   : > { %v777_v49 = vadd.f32 %v3236_v22, %v776_v48 }
 0x158   : > { %v809_v50 = vpack.c.bf16 %v777_v49, %v777_v49 }
 0x15a   : > { %826 = vst.msk [vmem:[#allocation3 + $0x14] sm:$0xf] %vm820_vm4, %v809_v50 }
 0x15d   : > { %v779_v51 = vpop.f32.mrf.mxu1 }
 0x15e   : > { %v780_v52 = vadd.f32 %v3236_v22, %v779_v51 }
 0x160   : > { %v810_v53 = vpack.c.bf16 %v780_v52, %v780_v52 }
 0x162   : > { %827 = vst.msk [vmem:[#allocation3 + $0x18] sm:$0xf] %vm820_vm4, %v810_v53 }
 0x165   : > { %v781_v54 = vpop.f32.mrf.mxu1 }
 0x166   : > { %v782_v55 = vadd.f32 %v3236_v22, %v781_v54 }
 0x168   : > { %v811_v56 = vpack.c.bf16 %v782_v55, %v782_v55 }
 0x16a   : > { %828 = vst.msk [vmem:[#allocation3 + $0x1c] sm:$0xf] %vm820_vm4, %v811_v56 }
 0x16b   : > { %v784_v57 = vpop.f32.mrf.mxu2 }
 0x16c   : > { %v785_v58 = vadd.f32 %v3236_v22, %v784_v57 }
 0x16e   : > { %v812_v59 = vpack.c.bf16 %v785_v58, %v785_v58 }
 0x170   : > { %829 = vst.msk [vmem:[#allocation3 + $0x20] sm:$0xf] %vm820_vm4, %v812_v59 }
 0x173   : > { %v786_v60 = vpop.f32.mrf.mxu2 }
 0x174   : > { %v787_v61 = vadd.f32 %v3236_v22, %v786_v60 }
 0x176   : > { %v813_v62 = vpack.c.bf16 %v787_v61, %v787_v61 }
 0x178   : > { %830 = vst.msk [vmem:[#allocation3 + $0x24] sm:$0xf] %vm820_vm4, %v813_v62 }
 0x17b   : > { %v789_v63 = vpop.f32.mrf.mxu2 }
 0x17c   : > { %v790_v0 = vadd.f32 %v3236_v22, %v789_v63 }
 0x17e   : > { %v814_v1 = vpack.c.bf16 %v790_v0, %v790_v0 }
 0x180   : > { %831 = vst.msk [vmem:[#allocation3 + $0x28] sm:$0xf] %vm820_vm4, %v814_v1 }
 0x183   : > { %v791_v2 = vpop.f32.mrf.mxu2 }
 0x184   : > { %v792_v3 = vadd.f32 %v3236_v22, %v791_v2 }
 0x186   : > { %v815_v4 = vpack.c.bf16 %v792_v3, %v792_v3 }
 0x188   : > { %832 = vst.msk [vmem:[#allocation3 + $0x2c] sm:$0xf] %vm820_vm4, %v815_v4 }
 0x18b   : > { %v794_v5 = vpop.f32.mrf.mxu2 }
 0x18c   : > { %v795_v6 = vadd.f32 %v3236_v22, %v794_v5 }
 0x18e   : > { %v816_v7 = vpack.c.bf16 %v795_v6, %v795_v6 }
 0x190   : > { %833 = vst.msk [vmem:[#allocation3 + $0x30] sm:$0xf] %vm820_vm4, %v816_v7 }
 0x193   : > { %v796_v8 = vpop.f32.mrf.mxu2 }
 0x194   : > { %v797_v9 = vadd.f32 %v3236_v22, %v796_v8 }
 0x196   : > { %v817_v10 = vpack.c.bf16 %v797_v9, %v797_v9 }
 0x198   : > { %834 = vst.msk [vmem:[#allocation3 + $0x34] sm:$0xf] %vm820_vm4, %v817_v10 }
 0x19b   : > { %v799_v11 = vpop.f32.mrf.mxu2 }
 0x19c   : > { %v800_v12 = vadd.f32 %v3236_v22, %v799_v11 }
 0x19e   : > { %v818_v13 = vpack.c.bf16 %v800_v12, %v800_v12 }
 0x1a0   : > { %835 = vst.msk [vmem:[#allocation3 + $0x38] sm:$0xf] %vm820_vm4, %v818_v13 }
 0x1a3   : > { %v801_v14 = vpop.f32.mrf.mxu2 }
 0x1a4   : > { %v802_v15 = vadd.f32 %v3236_v22, %v801_v14 }
 0x1a6   : > { %v819_v16 = vpack.c.bf16 %v802_v15, %v802_v15 }
 0x1a8   : > { %836 = vst.msk [vmem:[#allocation3 + $0x3c] sm:$0xf] %vm820_vm4, %v819_v16 }
 0x1a9 PF: > { %v904_v17 = vld [vmem:[%s3896_s2 + $0x10] sm:$0xff]  ;;  %v903_v18 = vld [vmem:[%s3896_s2 + $0x8] sm:$0xff]  ;;  %v902_v19 = vld [vmem:[%s3896_s2] sm:$0xff]  ;;  %vm909_vm3 = vcmask 195584   ;;  %vm1099_vm7 = vcmask 261120   ;;  %s2932_s22 = smov 64  }
 0x1aa   : > { %971 = vmatpush.msra.mxu0 %v904_v17  ;;  %v886_v20 = vld [vmem:[%s3058_s23] sm:$0xff]  ;;  %v887_v21 = vld [vmem:[%s3058_s23 + $0x8] sm:$0xff]  ;;  %v888_v23 = vld [vmem:[%s3058_s23 + $0x10] sm:$0xff]  ;;  %p2617_p10 = scmp.ne.s32.totalorder %s2904_s21, 1 }
 0x1ab   : > { %v889_v24 = vld [vmem:[%s3058_s23 + $0x18] sm:$0xff]  ;;  %v890_v25 = vld [vmem:[%s3058_s23 + $0x20] sm:$0xff]  ;;  %v891_v26 = vld [vmem:[%s3058_s23 + $0x28] sm:$0xff] }
 0x1ac   : > { %972 = vmatpush.msra.mxu0 %v903_v18  ;;  %v892_v27 = vld [vmem:[%s3058_s23 + $0x30] sm:$0xff]  ;;  %v893_v28 = vld [vmem:[%s3058_s23 + $0x38] sm:$0xff]  ;;  %v894_v29 = vld [vmem:[%s3058_s23 + $0x40] sm:$0xff] }
 0x1ad   : > { %v895_v30 = vld [vmem:[%s3058_s23 + $0x48] sm:$0xff]  ;;  %v896_v31 = vld [vmem:[%s3058_s23 + $0x50] sm:$0xff]  ;;  %v897_v32 = vld [vmem:[%s3058_s23 + $0x58] sm:$0xff] }
 0x1ae   : > { %973 = vmatpush.msra.mxu0 %v902_v19  ;;  %v898_v22 = vld [vmem:[%s3058_s23 + $0x60] sm:$0xff]  ;;  %v2663_v33 = vld [vmem:[%s3900_s6 + $0x8] sm:$0xff]  ;;  %v900_v36 = vld [vmem:[%s3058_s23 + $0x70] sm:$0xff] }
 0x1af   : > { %2545 = vmatmul.msk.f32.vlgmr.msra.gmra.mxu0 %vm909_vm3, %v886_v20  ;;  %v899_v34 = vld [vmem:[%s3058_s23 + $0x68] sm:$0xff]  ;;  %1130 = vmatpush.bf16.msra.mxu1 %v2663_v33  ;;  %v2662_v35 = vld [vmem:[%s3900_s6] sm:$0xff]  ;;  %v901_v37 = vld [vmem:[%s3058_s23 + $0x78] sm:$0xff] }
 0x1b0   : > { %v3320_v39 = vld [vmem:[%s3897_s3] ss:$0 sm:$0xff] }
 0x1b3   : > { %1131 = vmatpush.bf16.msra.mxu1 %v2662_v35 }
 0x1b7   : > { %2546 = vmatmul.msk.f32.gmra.mxu0 %vm909_vm3, %v887_v21 }
 0x1bf   : > { %2547 = vmatmul.msk.f32.gmra.mxu0 %vm909_vm3, %v888_v23 }
 0x1c7   : > { %2548 = vmatmul.msk.f32.gmra.mxu0 %vm909_vm3, %v889_v24 }
 0x1cf   : > { %2549 = vmatmul.msk.f32.gmra.mxu0 %vm909_vm3, %v890_v25 }
 0x1d7   : > { %2550 = vmatmul.msk.f32.gmra.mxu0 %vm909_vm3, %v891_v26 }
 0x1df   : > { %2551 = vmatmul.msk.f32.gmra.mxu0 %vm909_vm3, %v892_v27 }
 0x1e7   : > { %2552 = vmatmul.msk.f32.gmra.mxu0 %vm909_vm3, %v893_v28 }
 0x1ef   : > { %2553 = vmatmul.msk.f32.gmra.mxu0 %vm909_vm3, %v894_v29 }
 0x1f7   : > { %2554 = vmatmul.msk.f32.gmra.mxu0 %vm909_vm3, %v895_v30 }
 0x1ff   : > { %2555 = vmatmul.msk.f32.gmra.mxu0 %vm909_vm3, %v896_v31 }
 0x207   : > { %2556 = vmatmul.msk.f32.gmra.mxu0 %vm909_vm3, %v897_v32 }
 0x20f   : > { %2557 = vmatmul.msk.f32.gmra.mxu0 %vm909_vm3, %v898_v22 }
 0x217   : > { %2558 = vmatmul.msk.f32.gmra.mxu0 %vm909_vm3, %v899_v34 }
 0x21f   : > { %2559 = vmatmul.msk.f32.gmra.mxu0 %vm909_vm3, %v900_v36 }
 0x227   : > { %2560 = vmatmul.msk.f32.gmra.mxu0 %vm909_vm3, %v901_v37 }
 0x22c   : > { %v975_v38 = vpop.f32.mrf.mxu0 }
 0x22d   : > { %v976_v40 = vadd.f32 %v3320_v39, %v975_v38 }
 0x22f   : > { %v1039_v42 = vmul.f32 0.2, %v976_v40  ;;  %vm1023_vm5 = vcmp.gt.f32.partialorder %v976_v40, 0.0 }
 0x231   : > { %v1055_v45 = vsel %vm1023_vm5, %v976_v40, %v1039_v42 }
 0x234   : > { %v978_v41 = vpop.f32.mrf.mxu0 }
 0x235   : > { %v979_v43 = vadd.f32 %v3320_v39, %v978_v41 }
 0x237   : > { %vm1024_vm6 = vcmp.gt.f32.partialorder %v979_v43, 0.0  ;;  %v1040_v44 = vmul.f32 0.2, %v979_v43 }
 0x239   : > { %v1056_v46 = vsel %vm1024_vm6, %v979_v43, %v1040_v44  ;;  %vm1237_vm6 = vcmask 523264  }
 0x23a   : > { %v1071_v47 = vpack.c.bf16 %v1056_v46, %v1055_v45 }
 0x23c   : > { %v981_v48 = vpop.f32.mrf.mxu0  ;;  %2569 = vmatmul.msk.bf16.vlgmr.msra.gmra.mxu1 %vm1099_vm7, %v1071_v47 }
 0x23d   : > { %v982_v49 = vadd.f32 %v3320_v39, %v981_v48 }
 0x23f   : > { %v1041_v51 = vmul.f32 0.2, %v982_v49  ;;  %vm1025_vm8 = vcmp.gt.f32.partialorder %v982_v49, 0.0 }
 0x241   : > { %v1057_v54 = vsel %vm1025_vm8, %v982_v49, %v1041_v51  ;;  %v2772_v49 = vld [vmem:[%s3901_s7] ss:$0 sm:$0xff]  ;;  %vm1655_vm8 = vcmask 7168  }
 0x244   : > { %v984_v50 = vpop.f32.mrf.mxu0 }
 0x245   : > { %v985_v52 = vadd.f32 %v3320_v39, %v984_v50 }
 0x247   : > { %vm1026_vm9 = vcmp.gt.f32.partialorder %v985_v52, 0.0  ;;  %v1042_v53 = vmul.f32 0.2, %v985_v52 }
 0x249   : > { %v1058_v55 = vsel %vm1026_vm9, %v985_v52, %v1042_v53 }
 0x24a   : > { %v1072_v56 = vpack.c.bf16 %v1058_v55, %v1057_v54 }
 0x24c   : > { %v987_v57 = vpop.f32.mrf.mxu0  ;;  %2570 = vmatmul.msk.bf16.gmra.mxu1 %vm1099_vm7, %v1072_v56 }
 0x24d   : > { %v988_v58 = vadd.f32 %v3320_v39, %v987_v57 }
 0x24f   : > { %v1043_v60 = vmul.f32 0.2, %v988_v58  ;;  %vm1027_vm10 = vcmp.gt.f32.partialorder %v988_v58, 0.0 }
 0x251   : > { %v1059_v63 = vsel %vm1027_vm10, %v988_v58, %v1043_v60 }
 0x254   : > { %v990_v59 = vpop.f32.mrf.mxu0 }
 0x255   : > { %v991_v61 = vadd.f32 %v3320_v39, %v990_v59 }
 0x257   : > { %vm1028_vm11 = vcmp.gt.f32.partialorder %v991_v61, 0.0  ;;  %v1044_v62 = vmul.f32 0.2, %v991_v61 }
 0x259   : > { %v1060_v0 = vsel %vm1028_vm11, %v991_v61, %v1044_v62 }
 0x25a   : > { %v1073_v1 = vpack.c.bf16 %v1060_v0, %v1059_v63 }
 0x25c   : > { %v993_v2 = vpop.f32.mrf.mxu0  ;;  %2571 = vmatmul.msk.bf16.gmra.mxu1 %vm1099_vm7, %v1073_v1 }
 0x25d   : > { %v994_v3 = vadd.f32 %v3320_v39, %v993_v2 }
 0x25f   : > { %v1045_v5 = vmul.f32 0.2, %v994_v3  ;;  %vm1029_vm12 = vcmp.gt.f32.partialorder %v994_v3, 0.0 }
 0x261   : > { %v1061_v8 = vsel %vm1029_vm12, %v994_v3, %v1045_v5 }
 0x264   : > { %v996_v4 = vpop.f32.mrf.mxu0 }
 0x265   : > { %v997_v6 = vadd.f32 %v3320_v39, %v996_v4 }
 0x267   : > { %vm1030_vm13 = vcmp.gt.f32.partialorder %v997_v6, 0.0  ;;  %v1046_v7 = vmul.f32 0.2, %v997_v6 }
 0x269   : > { %v1062_v9 = vsel %vm1030_vm13, %v997_v6, %v1046_v7 }
 0x26a   : > { %v1074_v10 = vpack.c.bf16 %v1062_v9, %v1061_v8 }
 0x26c   : > { %v999_v11 = vpop.f32.mrf.mxu0  ;;  %2572 = vmatmul.msk.bf16.gmra.mxu1 %vm1099_vm7, %v1074_v10 }
 0x26d   : > { %v1000_v12 = vadd.f32 %v3320_v39, %v999_v11 }
 0x26f   : > { %v1047_v14 = vmul.f32 0.2, %v1000_v12  ;;  %vm1031_vm14 = vcmp.gt.f32.partialorder %v1000_v12, 0.0 }
 0x271   : > { %v1063_v17 = vsel %vm1031_vm14, %v1000_v12, %v1047_v14 }
 0x274   : > { %v1002_v13 = vpop.f32.mrf.mxu0 }
 0x275   : > { %v1003_v15 = vadd.f32 %v3320_v39, %v1002_v13 }
 0x277   : > { %vm1032_vm15 = vcmp.gt.f32.partialorder %v1003_v15, 0.0  ;;  %v1048_v16 = vmul.f32 0.2, %v1003_v15 }
 0x279   : > { %v1064_v18 = vsel %vm1032_vm15, %v1003_v15, %v1048_v16 }
 0x27a   : > { %v1075_v19 = vpack.c.bf16 %v1064_v18, %v1063_v17 }
 0x27c   : > { %v1005_v20 = vpop.f32.mrf.mxu0  ;;  %2573 = vmatmul.msk.bf16.gmra.mxu1 %vm1099_vm7, %v1075_v19 }
 0x27d   : > { %v1006_v21 = vadd.f32 %v3320_v39, %v1005_v20 }
 0x27f   : > { %v1049_v24 = vmul.f32 0.2, %v1006_v21  ;;  %vm1033_vm0 = vcmp.gt.f32.partialorder %v1006_v21, 0.0 }
 0x281   : > { %v1065_v27 = vsel %vm1033_vm0, %v1006_v21, %v1049_v24 }
 0x284   : > { %v1008_v23 = vpop.f32.mrf.mxu0 }
 0x285   : > { %v1009_v25 = vadd.f32 %v3320_v39, %v1008_v23 }
 0x287   : > { %vm1034_vm1 = vcmp.gt.f32.partialorder %v1009_v25, 0.0  ;;  %v1050_v26 = vmul.f32 0.2, %v1009_v25 }
 0x289   : > { %v1066_v28 = vsel %vm1034_vm1, %v1009_v25, %v1050_v26 }
 0x28a   : > { %v1076_v29 = vpack.c.bf16 %v1066_v28, %v1065_v27 }
 0x28c   : > { %v1011_v30 = vpop.f32.mrf.mxu0  ;;  %2574 = vmatmul.msk.bf16.gmra.mxu1 %vm1099_vm7, %v1076_v29 }
 0x28d   : > { %v1012_v31 = vadd.f32 %v3320_v39, %v1011_v30 }
 0x28f   : > { %v1051_v22 = vmul.f32 0.2, %v1012_v31  ;;  %vm1035_vm2 = vcmp.gt.f32.partialorder %v1012_v31, 0.0 }
 0x291   : > { %v1067_v35 = vsel %vm1035_vm2, %v1012_v31, %v1051_v22  ;;  %v2664_v22 = vld [vmem:[#allocation3] sm:$0xff] }
 0x294   : > { %v1014_v32 = vpop.f32.mrf.mxu0 }
 0x295   : > { %v1015_v33 = vadd.f32 %v3320_v39, %v1014_v32 }
 0x297   : > { %vm1036_vm4 = vcmp.gt.f32.partialorder %v1015_v33, 0.0  ;;  %v1052_v34 = vmul.f32 0.2, %v1015_v33 }
 0x299   : > { %v1068_v36 = vsel %vm1036_vm4, %v1015_v33, %v1052_v34  ;;  %v2665_v33 = vld [vmem:[#allocation3 + $0x8] sm:$0xff]  ;;  %v2666_v34 = vld [vmem:[#allocation3 + $0x10] sm:$0xff] }
 0x29a   : > { %v1077_v37 = vpack.c.bf16 %v1068_v36, %v1067_v35 }
 0x29c   : > { %v1017_v38 = vpop.f32.mrf.mxu0  ;;  %2575 = vmatmul.msk.bf16.gmra.mxu1 %vm1099_vm7, %v1077_v37  ;;  %v2667_v37 = vld [vmem:[#allocation3 + $0x18] sm:$0xff] }
 0x29d   : > { %v1018_v40 = vadd.f32 %v3320_v39, %v1017_v38 }
 0x29f   : > { %v1053_v42 = vmul.f32 0.2, %v1018_v40  ;;  %vm1037_vm3 = vcmp.gt.f32.partialorder %v1018_v40, 0.0 }
 0x2a1   : > { %v1069_v45 = vsel %vm1037_vm3, %v1018_v40, %v1053_v42 }
 0x2a4   : > { %v1020_v41 = vpop.f32.mrf.mxu0 }
 0x2a5   : > { %v1021_v43 = vadd.f32 %v3320_v39, %v1020_v41 }
 0x2a7   : > { %vm1038_vm5 = vcmp.gt.f32.partialorder %v1021_v43, 0.0  ;;  %v1054_v44 = vmul.f32 0.2, %v1021_v43 }
 0x2a9   : > { %v1070_v46 = vsel %vm1038_vm5, %v1021_v43, %v1054_v44  ;;  %v2668_v43 = vld [vmem:[#allocation3 + $0x20] sm:$0xff] }
 0x2aa   : > { %v1078_v47 = vpack.c.bf16 %v1070_v46, %v1069_v45  ;;  %v2669_v46 = vld [vmem:[#allocation3 + $0x28] sm:$0xff] }
 0x2ac   : > { %2576 = vmatmul.msk.bf16.gmra.mxu1 %vm1099_vm7, %v1078_v47  ;;  %v2670_v47 = vld [vmem:[#allocation3 + $0x30] sm:$0xff] }
 0x2b9   : > { %v1133_v48 = vpop.f32.mrf.mxu1 }
 0x2ba   : > { %v1134_v51 = vadd.f32 %v2772_v49, %v1133_v48 }
 0x2c1   : > { %v1135_v50 = vpop.f32.mrf.mxu1 }
 0x2c2   : > { %v1136_v52 = vadd.f32 %v2772_v49, %v1135_v50 }
 0x2c4   : > { %v3349_v53 = vpack.c.bf16 %v1136_v52, %v1134_v51 }
 0x2c6   : > { %1800 = vrot.lane.b32.xlu0 %v3349_v53, %s2932_s22  ;;  %v1263_v32 = vsel %vm1237_vm6, %v3349_v53, 0  ;;  %v2671_v53 = vld [vmem:[#allocation3 + $0x38] sm:$0xff] }
 0x2c9   : > { %v1138_v39 = vpop.f32.mrf.mxu1 }
 0x2ca   : > { %v1139_v55 = vadd.f32 %v2772_v49, %v1138_v39 }
 0x2d1   : > { %v1140_v54 = vpop.f32.mrf.mxu1 }
 0x2d2   : > { %v1141_v56 = vadd.f32 %v2772_v49, %v1140_v54 }
 0x2d4   : > { %v3353_v57 = vpack.c.bf16 %v1141_v56, %v1139_v55 }
 0x2d6   : > { %1802 = vrot.lane.b32.xlu0 %v3353_v57, %s2932_s22  ;;  %v1266_v31 = vsel %vm1237_vm6, %v3353_v57, 0 }
 0x2d9   : > { %v1143_v58 = vpop.f32.mrf.mxu1 }
 0x2da   : > { %v1144_v60 = vadd.f32 %v2772_v49, %v1143_v58 }
 0x2e1   : > { %v1145_v59 = vpop.f32.mrf.mxu1 }
 0x2e2   : > { %v1146_v61 = vadd.f32 %v2772_v49, %v1145_v59 }
 0x2e4   : > { %v1175_v62 = vpack.c.bf16 %v1146_v61, %v1144_v60  ;;  %v2933_v60 = vmov 0   ;;  %v3417_v61 = vld [vmem:[#allocation4 + $0x10] sm:$0xff] }
 0x2e5   : > { %2769 = vset.pattern.permute.xlu0 %v2933_v60  ;;  %2768 = vset.pattern.permute.xlu2 %v2933_v60 }
 0x2e6   : > { %1804 = vrot.lane.b32.xlu2 %v1175_v62, %s2932_s22  ;;  %v1269_v30 = vsel %vm1237_vm6, %v1175_v62, 0  ;;  %2770 = vset.pattern.permute.xlu1 %v2933_v60  ;;  %v3419_v62 = vld [vmem:[#allocation4] sm:$0xff] }
 0x2e9   : > { %v1148_v63 = vpop.f32.mrf.mxu1 }
 0x2ea   : > { %v1149_v1 = vadd.f32 %v2772_v49, %v1148_v63 }
 0x2f1   : > { %v1150_v0 = vpop.f32.mrf.mxu1 }
 0x2f2   : > { %v1151_v2 = vadd.f32 %v2772_v49, %v1150_v0 }
 0x2f4   : > { %v1176_v3 = vpack.c.bf16 %v1151_v2, %v1149_v1 }
 0x2f6   : > { %1806 = vrot.lane.b32.xlu0 %v1176_v3, %s2932_s22  ;;  %v1272_v29 = vsel %vm1237_vm6, %v1176_v3, 0 }
 0x2f9   : > { %v1153_v4 = vpop.f32.mrf.mxu1 }
 0x2fa   : > { %v1154_v6 = vadd.f32 %v2772_v49, %v1153_v4 }
 0x301   : > { %v1155_v5 = vpop.f32.mrf.mxu1 }
 0x302   : > { %v1156_v7 = vadd.f32 %v2772_v49, %v1155_v5  ;;  %v3437_v5 = vld [vmem:[#allocation4 + $0x20] sm:$0xff] }
 0x304   : > { %v1177_v8 = vpack.c.bf16 %v1156_v7, %v1154_v6  ;;  %v3439_v6 = vld [vmem:[#allocation4 + $0x18] sm:$0xff]  ;;  %v3441_v7 = vld [vmem:[#allocation4 + $0x8] sm:$0xff] }
 0x306   : > { %1808 = vrot.lane.b32.xlu2 %v1177_v8, %s2932_s22  ;;  %v1275_v28 = vsel %vm1237_vm6, %v1177_v8, 0 }
 0x309   : > { %v1158_v9 = vpop.f32.mrf.mxu1 }
 0x30a   : > { %v1159_v11 = vadd.f32 %v2772_v49, %v1158_v9 }
 0x311   : > { %v1160_v10 = vpop.f32.mrf.mxu1 }
 0x312   : > { %v1161_v12 = vadd.f32 %v2772_v49, %v1160_v10 }
 0x314   : > { %v1178_v13 = vpack.c.bf16 %v1161_v12, %v1159_v11 }
 0x316   : > { %1810 = vrot.lane.b32.xlu1 %v1178_v13, %s2932_s22  ;;  %v1278_v27 = vsel %vm1237_vm6, %v1178_v13, 0 }
 0x319   : > { %v1163_v14 = vpop.f32.mrf.mxu1 }
 0x31a   : > { %v1164_v16 = vadd.f32 %v2772_v49, %v1163_v14 }
 0x321   : > { %v1165_v15 = vpop.f32.mrf.mxu1 }
 0x322   : > { %v1166_v17 = vadd.f32 %v2772_v49, %v1165_v15 }
 0x324   : > { %v1179_v18 = vpack.c.bf16 %v1166_v17, %v1164_v16  ;;  %v3466_v17 = vld [vmem:[#allocation4 + $0x28] sm:$0xff] }
 0x326   : > { %1812 = vrot.lane.b32.xlu0 %v1179_v18, %s2932_s22  ;;  %v1281_v26 = vsel %vm1237_vm6, %v1179_v18, 0 }
 0x329   : > { %v1168_v19 = vpop.f32.mrf.mxu1 }
 0x32a   : > { %v1169_v21 = vadd.f32 %v2772_v49, %v1168_v19 }
 0x331   : > { %v1170_v20 = vpop.f32.mrf.mxu1 }
 0x332   : > { %v1171_v23 = vadd.f32 %v2772_v49, %v1170_v20 }
 0x334   : > { %v1180_v24 = vpack.c.bf16 %v1171_v23, %v1169_v21  ;;  %v3477_v21 = vld [vmem:[#allocation4 + $0x30] sm:$0xff] }
 0x336   : > { %1814 = vrot.lane.b32.xlu2 %v1180_v24, %s2932_s22  ;;  %v1284_v25 = vsel %vm1237_vm6, %v1180_v24, 0 }
 0x337   : > { %1286 = vmatpush.bf16.xpose.msrb.mxu0 %v1284_v25  ;;  %2683 = vmatpush.bf16.xpose.msrb.mxu1 %v1284_v25 }
 0x338   : > { %2684 = vmatpush.bf16.xpose.msra.mxu2 %v1284_v25  ;;  %v1801_v35 = vpop.permute.xlu0 %1800 }
 0x33f   : > { %1287 = vmatpush.bf16.xpose.msrb.mxu0 %v1281_v26  ;;  %2685 = vmatpush.bf16.xpose.msrb.mxu1 %v1281_v26 }
 0x340   : > { %2686 = vmatpush.bf16.xpose.msra.mxu2 %v1281_v26  ;;  %v1805_v36 = vpop.permute.xlu2 %1804  ;;  %v3487_v26 = vld [vmem:[#allocation4 + $0x38] sm:$0xff] }
 0x347   : > { %1288 = vmatpush.bf16.xpose.msrb.mxu0 %v1278_v27  ;;  %2687 = vmatpush.bf16.xpose.msrb.mxu1 %v1278_v27 }
 0x348   : > { %2688 = vmatpush.bf16.xpose.msra.mxu2 %v1278_v27  ;;  %v1803_v38 = vpop.permute.xlu0 %1802 }
 0x34f   : > { %1289 = vmatpush.bf16.xpose.msrb.mxu0 %v1275_v28  ;;  %2689 = vmatpush.bf16.xpose.msrb.mxu1 %v1275_v28 }
 0x350   : > { %2690 = vmatpush.bf16.xpose.msra.mxu2 %v1275_v28 }
 0x357   : > { %1290 = vmatpush.bf16.xpose.msrb.mxu0 %v1272_v29  ;;  %2691 = vmatpush.bf16.xpose.msrb.mxu1 %v1272_v29 }
 0x358   : > { %2692 = vmatpush.bf16.xpose.msra.mxu2 %v1272_v29 }
 0x35f   : > { %1291 = vmatpush.bf16.xpose.msrb.mxu0 %v1269_v30  ;;  %2693 = vmatpush.bf16.xpose.msrb.mxu1 %v1269_v30 }
 0x360   : > { %2694 = vmatpush.bf16.xpose.msra.mxu2 %v1269_v30  ;;  %v1809_v40 = vpop.permute.xlu2 %1808  ;;  %v3497_v30 = vld [vmem:[#allocation4 + $0x40] sm:$0xff] }
 0x367   : > { %1292 = vmatpush.bf16.xpose.msrb.mxu0 %v1266_v31  ;;  %2695 = vmatpush.bf16.xpose.msrb.mxu1 %v1266_v31 }
 0x368   : > { %2696 = vmatpush.bf16.xpose.msra.mxu2 %v1266_v31  ;;  %v1807_v41 = vpop.permute.xlu0 %1806 }
 0x36f   : > { %1293 = vmatpush.bf16.xpose.msrb.mxu0 %v1263_v32  ;;  %2697 = vmatpush.bf16.xpose.msrb.mxu1 %v1263_v32 }
 0x370   : > { %2698 = vmatpush.bf16.xpose.msra.mxu2 %v1263_v32 }
 0x376   : > { %2609 = vmatmul.msk.bf16.vlgmr.msrb.gmra.mxu0 %vm1237_vm6, %v2664_v22  ;;  %2610 = vmatmul.msk.bf16.vlgmr.msrb.gmra.mxu1 %vm1237_vm6, %v2665_v33 }
 0x377   : > { %2611 = vmatmul.msk.bf16.vlgmr.msra.gmra.mxu2 %vm1237_vm6, %v2666_v34  ;;  %v3509_v34 = vld [vmem:[#allocation4 + $0x48] sm:$0xff] }
 0x387   : > { %2612 = vmatmul.msk.bf16.gmra.mxu2 %vm1237_vm6, %v2667_v37 }
 0x388   : > { %v1811_v45 = vpop.permute.xlu1 %1810 }
 0x390   : > { %v1815_v42 = vpop.permute.xlu2 %1814 }
 0x391   : > { %1824 = vmatpush.bf16.msra.mxu3 %v1815_v42 }
 0x397   : > { %2613 = vmatmul.msk.bf16.gmra.mxu2 %vm1237_vm6, %v2668_v43 }
 0x398   : > { %v1813_v44 = vpop.permute.xlu0 %1812 }
 0x399   : > { %1825 = vmatpush.bf16.msra.mxu3 %v1813_v44  ;;  %v3530_v44 = vld [vmem:[#allocation4 + $0x58] sm:$0xff] }
 0x39d   : > { %1826 = vmatpush.bf16.msra.mxu3 %v1811_v45 }
 0x3a1   : > { %1827 = vmatpush.bf16.msra.mxu3 %v1809_v40  ;;  %v3521_v40 = vld [vmem:[#allocation4 + $0x50] sm:$0xff] }
 0x3a5   : > { %1828 = vmatpush.bf16.msra.mxu3 %v1807_v41 }
 0x3a7   : > { %2614 = vmatmul.msk.bf16.gmra.mxu2 %vm1237_vm6, %v2669_v46 }
 0x3a9   : > { %1829 = vmatpush.bf16.msra.mxu3 %v1805_v36 }
 0x3ad   : > { %1830 = vmatpush.bf16.msra.mxu3 %v1803_v38 }
 0x3b1   : > { %1831 = vmatpush.bf16.msra.mxu3 %v1801_v35 }
 0x3b7   : > { %2615 = vmatmul.msk.bf16.gmra.mxu2 %vm1237_vm6, %v2670_v47 }
 0x3c7   : > { %2616 = vmatmul.msk.bf16.gmra.mxu2 %vm1237_vm6, %v2671_v53 }
 0x3f3   : > { %v3380_v48 = vpop.f32.mrf.mxu0  ;;  %v3382_v49 = vpop.f32.mrf.mxu1 }
 0x3f4   : > { %1355 = vmax.xlane.f32.xlu1 %v3382_v49  ;;  %1351 = vmax.xlane.f32.xlu0 %v3380_v48 }
 0x3fa   : > { %v3386_v50 = vpop.f32.mrf.mxu2 }
 0x3fb   : > { %v3388_v51 = vpop.f32.mrf.mxu0  ;;  %v3390_v52 = vpop.f32.mrf.mxu1  ;;  %1359 = vmax.xlane.f32.xlu2 %v3386_v50 }
 0x3fc   : > { %1357 = vmax.xlane.f32.xlu1 %v3390_v52  ;;  %1353 = vmax.xlane.f32.xlu0 %v3388_v51 }
 0x402   : > { %v3396_v39 = vpop.f32.mrf.mxu2 }
 0x404   : > { %1361 = vmax.xlane.f32.xlu1 %v3396_v39 }
 0x40a   : > { %v3399_v54 = vpop.f32.mrf.mxu2 }
 0x40c   : > { %1363 = vmax.xlane.f32.xlu1 %v3399_v54 }
 0x412   : > { %v3402_v55 = vpop.f32.mrf.mxu2 }
 0x413   : > { %1365 = vmax.xlane.f32.xlu2 %v3402_v55 }
 0x41a   : > { %v3405_v56 = vpop.f32.mrf.mxu2 }
 0x41b   : > { %1367 = vmax.xlane.f32.xlu1 %v3405_v56 }
 0x422   : > { %v3408_v57 = vpop.f32.mrf.mxu2 }
 0x423   : > { %1369 = vmax.xlane.f32.xlu0 %v3408_v57 }
 0x42a   : > { %v3411_v58 = vpop.f32.mrf.mxu2 }
 0x42b   : > { %1371 = vmax.xlane.f32.xlu2 %v3411_v58 }
 0x432   : > { %v3414_v59 = vpop.f32.mrf.mxu2 }
 0x433   : > { %1373 = vmax.xlane.f32.xlu1 %v3414_v59 }
 0x43a   : > { %v3502_v22 = vpop.f32.mrf.mxu2 }
 0x442   : > { %v3518_v38 = vpop.f32.mrf.mxu2 }
 0x44a   : > { %v3541_v53 = vpop.f32.mrf.mxu2 }
 0x452   : > { %v3546_v60 = vpop.f32.mrf.mxu2 }
 0x467   : > { %v1356_v63 = vpop.xlane.xlu1 %1355  ;;  %v1352_v0 = vpop.xlane.xlu0 %1351 }
 0x468   : > { %v3422_v1 = vmax.f32 %v3417_v61, %v1356_v63  ;;  %v3425_v2 = vmax.f32 %v3419_v62, %v1352_v0 }
 0x46a   : > { %v1401_v3 = vsub.f32 %v3417_v61, %v3422_v1  ;;  %1907 = vst.msk [vmem:[#allocation4 + $0x10] sm:$0xff] %vm1655_vm8, %v3422_v1  ;;  %v1399_v4 = vsub.f32 %v3419_v62, %v3425_v2  ;;  %1449 = vperm.xlu2 %2768, %v3425_v2   ;;  %1459 = vperm.xlu0 %2769, %v3422_v1  }
 0x46b   : > { %1905 = vst.msk [vmem:[#allocation4] sm:$0xff] %vm1655_vm8, %v3425_v2 }
 0x46e   : > { %v1360_v8 = vpop.xlane.xlu2 %1359 }
 0x46f   : > { %v3444_v9 = vmax.f32 %v3437_v5, %v1360_v8  ;;  %v1358_v10 = vpop.xlane.xlu1 %1357  ;;  %v1354_v11 = vpop.xlane.xlu0 %1353 }
 0x470   : > { %v3447_v12 = vmax.f32 %v3439_v6, %v1358_v10  ;;  %v3450_v13 = vmax.f32 %v3441_v7, %v1354_v11 }
 0x471   : > { %v1403_v14 = vsub.f32 %v3437_v5, %v3444_v9  ;;  %1909 = vst.msk [vmem:[#allocation4 + $0x20] sm:$0xff] %vm1655_vm8, %v3444_v9 }
 0x472   : > { %v1402_v15 = vsub.f32 %v3439_v6, %v3447_v12  ;;  %1908 = vst.msk [vmem:[#allocation4 + $0x18] sm:$0xff] %vm1655_vm8, %v3447_v12  ;;  %v1400_v16 = vsub.f32 %v3441_v7, %v3450_v13  ;;  %1469 = vperm.xlu2 %2768, %v3444_v9   ;;  %1454 = vperm.xlu0 %2769, %v3450_v13  }
 0x473   : > { %1906 = vst.msk [vmem:[#allocation4 + $0x8] sm:$0xff] %vm1655_vm8, %v3450_v13 }
 0x474   : > { %v1421_v62 = vmul.f32 1.442695, %v1402_v15 }
 0x477   : > { %v1362_v18 = vpop.xlane.xlu1 %1361 }
 0x478   : > { %v3469_v19 = vmax.f32 %v3466_v17, %v1362_v18 }
 0x47a   : > { %v1404_v20 = vsub.f32 %v3466_v17, %v3469_v19  ;;  %1910 = vst.msk [vmem:[#allocation4 + $0x28] sm:$0xff] %vm1655_vm8, %v3469_v19  ;;  %1474 = vperm.xlu1 %2770, %v3469_v19   ;;  %1464 = vperm.xlu0 %2769, %v3447_v12  }
 0x47c   : > { %v1425_v61 = vmul.f32 1.442695, %v1404_v20 }
 0x47f   : > { %v1364_v23 = vpop.xlane.xlu1 %1363 }
 0x480   : > { %v3480_v24 = vmax.f32 %v3477_v21, %v1364_v23 }
 0x482   : > { %v1405_v25 = vsub.f32 %v3477_v21, %v3480_v24  ;;  %1911 = vst.msk [vmem:[#allocation4 + $0x30] sm:$0xff] %vm1655_vm8, %v3480_v24  ;;  %1479 = vperm.xlu0 %2769, %v3480_v24  }
 0x484   : > { %v1427_v13 = vmul.f32 1.442695, %v1405_v25 }
 0x486   : > { %v1366_v27 = vpop.xlane.xlu2 %1365 }
 0x487   : > { %v3490_v28 = vmax.f32 %v3487_v26, %v1366_v27 }
 0x489   : > { %v1406_v29 = vsub.f32 %v3487_v26, %v3490_v28  ;;  %1912 = vst.msk [vmem:[#allocation4 + $0x38] sm:$0xff] %vm1655_vm8, %v3490_v28 }
 0x48a   : > { %1484 = vperm.xlu0 %2769, %v3490_v28  }
 0x48b   : > { %v1429_v6 = vmul.f32 1.442695, %v1406_v29 }
 0x48e   : > { %v1368_v31 = vpop.xlane.xlu1 %1367 }
 0x48f   : > { %v3500_v32 = vmax.f32 %v3497_v30, %v1368_v31 }
 0x491   : > { %v1407_v33 = vsub.f32 %v3497_v30, %v3500_v32  ;;  %1913 = vst.msk [vmem:[#allocation4 + $0x40] sm:$0xff] %vm1655_vm8, %v3500_v32  ;;  %1489 = vperm.xlu1 %2770, %v3500_v32  }
 0x496   : > { %v1370_v35 = vpop.xlane.xlu0 %1369 }
 0x497   : > { %v3512_v36 = vmax.f32 %v3509_v34, %v1370_v35 }
 0x499   : > { %v1408_v37 = vsub.f32 %v3509_v34, %v3512_v36  ;;  %1914 = vst.msk [vmem:[#allocation4 + $0x48] sm:$0xff] %vm1655_vm8, %v3512_v36  ;;  %v1347_v34 = vld [vmem:[#allocation4 + $0x60] sm:$0xff] }
 0x49b   : > { %1377 = vmax.xlane.f32.xlu2 %v3518_v38 }
 0x49e   : > { %v1372_v41 = vpop.xlane.xlu2 %1371 }
 0x49f   : > { %v3524_v42 = vmax.f32 %v3521_v40, %v1372_v41 }
 0x4a1   : > { %1915 = vst.msk [vmem:[#allocation4 + $0x50] sm:$0xff] %vm1655_vm8, %v3524_v42  ;;  %v3916_v15 = vsub.f32 %v3521_v40, %v3524_v42 }
 0x4a6   : > { %v1374_v45 = vpop.xlane.xlu1 %1373 }
 0x4a7   : > { %v3533_v46 = vmax.f32 %v3530_v44, %v1374_v45 }
 0x4a9   : > { %v1410_v47 = vsub.f32 %v3530_v44, %v3533_v46  ;;  %1916 = vst.msk [vmem:[#allocation4 + $0x58] sm:$0xff] %vm1655_vm8, %v3533_v46  ;;  %v1415_v44 = vmul.f32 1.442695, %v1399_v4 }
 0x4b3   : > { %1494 = vperm.xlu2 %2768, %v3512_v36  }
 0x4b4   : > { %1375 = vmax.xlane.f32.xlu0 %v3502_v22 }
 0x4bb   : > { %1379 = vmax.xlane.f32.xlu1 %v3541_v53 }
 0x4c4   : > { %v1450_v0 = vpop.permute.xlu2 %1449 }
 0x4c5   : > { %v1527_v8 = vsub.f32 %v3380_v48, %v1450_v0 }
 0x4c7   : > { %v1543_v10 = vmul.f32 1.442695, %v1527_v8 }
 0x4c8   : > { %1499 = vperm.xlu0 %2769, %v3524_v42  }
 0x4c9   : > { %2773 = vpow2.f32 %v1543_v10 }
 0x4cc   : > { %v1470_v10 = vpop.permute.xlu2 %1469 }
 0x4cf   : > { %v3551_v31 = vpop.eup %2773 }
 0x4d0   : > { %1504 = vperm.xlu0 %2769, %v3533_v46  }
 0x4dc   : > { %1381 = vmax.xlane.f32.xlu2 %v3546_v60  ;;  %v1460_v63 = vpop.permute.xlu0 %1459 }
 0x4dd   : > { %v1529_v43 = vsub.f32 %v3382_v49, %v1460_v63 }
 0x4df   : > { %v1547_v0 = vmul.f32 1.442695, %v1529_v43 }
 0x4e4   : > { %v1455_v11 = vpop.permute.xlu0 %1454 }
 0x4e5   : > { %v1528_v18 = vsub.f32 %v3388_v51, %v1455_v11 }
 0x4e7   : > { %v1545_v23 = vmul.f32 1.442695, %v1528_v18 }
 0x4e9   : > { %2775 = vpow2.f32 %v1545_v23  ;;  %v1531_v23 = vsub.f32 %v3386_v50, %v1470_v10 }
 0x4eb   : > { %v1551_v63 = vmul.f32 1.442695, %v1531_v23 }
 0x4ec   : > { %v1465_v27 = vpop.permute.xlu0 %1464  ;;  %v1475_v51 = vpop.permute.xlu1 %1474 }
 0x4ed   : > { %v1530_v41 = vsub.f32 %v3390_v52, %v1465_v27  ;;  %v1532_v18 = vsub.f32 %v3396_v39, %v1475_v51  ;;  %v1417_v39 = vmul.f32 1.442695, %v1400_v16 }
 0x4ef   : > { %v3553_v35 = vpop.eup %2775  ;;  %v1549_v48 = vmul.f32 1.442695, %v1530_v41  ;;  %v1553_v49 = vmul.f32 1.442695, %v1532_v18  ;;  %v3567_v41 = vld [vmem:[#allocation4 + $0x68] sm:$0xff] }
 0x4f0   : > { %v1784_v45 = vpack.c.bf16 %v3553_v35, %v3551_v31 }
 0x4f1   : > { %2777 = vpow2.f32 %v1549_v48 }
 0x4f2   : > { %1832 = vmatmul.bf16.vlgmr.msra.gmra.mxu3 %v1784_v45  ;;  %2779 = vpow2.f32 %v1547_v0 }
 0x4f3   : > { %2781 = vpow2.f32 %v1553_v49 }
 0x4f4   : > { %v1480_v27 = vpop.permute.xlu0 %1479  ;;  %2783 = vpow2.f32 %v1551_v63 }
 0x4f5   : > { %v1533_v18 = vsub.f32 %v3399_v54, %v1480_v27  ;;  %2785 = vpow2.f32 %v1417_v39  ;;  %v1433_v27 = vmul.f32 1.442695, %v1408_v37 }
 0x4f7   : > { %v3559_v8 = vpop.eup %2777 }
 0x4f8   : > { %v3561_v11 = vpop.eup %2779 }
 0x4f9   : > { %v1785_v52 = vpack.c.bf16 %v3559_v8, %v3561_v11  ;;  %v3569_v45 = vpop.eup %2781 }
 0x4fa   : > { %v3574_v0 = vpop.eup %2783 }
 0x4fb   : > { %v1786_v10 = vpack.c.bf16 %v3569_v45, %v3574_v0  ;;  %v3591_v16 = vpop.eup %2785 }
 0x4fc   : > { %v1485_v43 = vpop.permute.xlu0 %1484 }
 0x4fd   : > { %v1534_v50 = vsub.f32 %v3402_v55, %v1485_v43  ;;  %v1555_v55 = vmul.f32 1.442695, %v1533_v18 }
 0x4ff   : > { %v1557_v7 = vmul.f32 1.442695, %v1534_v50 }
 0x501   : > { %2787 = vpow2.f32 %v1557_v7  ;;  %v1419_v7 = vmul.f32 1.442695, %v1401_v3 }
 0x502   : > { %1837 = vmatmul.bf16.gmra.mxu3 %v1785_v52  ;;  %2789 = vpow2.f32 %v1555_v55 }
 0x503   : > { %2791 = vpow2.f32 %v1427_v13  ;;  %v1490_v49 = vpop.permute.xlu1 %1489 }
 0x504   : > { %v1535_v43 = vsub.f32 %v3405_v56, %v1490_v49  ;;  %2793 = vpow2.f32 %v1433_v27 }
 0x507   : > { %v3594_v23 = vpop.eup %2787 }
 0x508   : > { %v3599_v63 = vpop.eup %2789 }
 0x509   : > { %v3602_v24 = vpop.eup %2791  ;;  %v1787_v25 = vpack.c.bf16 %v3594_v23, %v3599_v63 }
 0x50a   : > { %v3608_v37 = vpop.eup %2793 }
 0x50e   : > { %v1378_v48 = vpop.xlane.xlu2 %1377 }
 0x50f   : > { %v3578_v51 = vmax.f32 %v3567_v41, %v1378_v48  ;;  %v1559_v48 = vmul.f32 1.442695, %v1535_v43 }
 0x511   : > { %v1412_v52 = vsub.f32 %v3567_v41, %v3578_v51  ;;  %1918 = vst.msk [vmem:[#allocation4 + $0x68] sm:$0xff] %vm1655_vm8, %v3578_v51  ;;  %1514 = vperm.xlu1 %2770, %v3578_v51  }
 0x512   : > { %1842 = vmatmul.bf16.gmra.mxu3 %v1786_v10  ;;  %v1349_v10 = vld [vmem:[#allocation4 + $0x70] sm:$0xff] }
 0x516   : > { %v1495_v54 = vpop.permute.xlu2 %1494 }
 0x517   : > { %v1536_v21 = vsub.f32 %v3408_v57, %v1495_v54 }
 0x519   : > { %1695 = vperm.xlu1 %2770, %v3591_v16   ;;  %v1561_v39 = vmul.f32 1.442695, %v1536_v21  ;;  %v1431_v21 = vmul.f32 1.442695, %v1407_v33 }
 0x51b   : > { %2795 = vpow2.f32 %v1561_v39 }
 0x51c   : > { %2797 = vpow2.f32 %v1559_v48  ;;  %v1437_v48 = vmul.f32 1.442695, %v1410_v47 }
 0x521   : > { %1720 = vperm.xlu1 %2770, %v3602_v24   ;;  %v3612_v18 = vpop.eup %2795 }
 0x522   : > { %1847 = vmatmul.bf16.gmra.mxu3 %v1787_v25  ;;  %v3617_v13 = vpop.eup %2797 }
 0x523   : > { %v1788_v27 = vpack.c.bf16 %v3612_v18, %v3617_v13 }
 0x527   : > { %v1376_v36 = vpop.xlane.xlu0 %1375 }
 0x528   : > { %v1395_v50 = vmax.f32 %v1347_v34, %v1376_v36 }
 0x529   : > { %1735 = vperm.xlu1 %2770, %v3608_v37  }
 0x52a   : > { %v1411_v57 = vsub.f32 %v1347_v34, %v1395_v50  ;;  %1917 = vst.msk [vmem:[#allocation4 + $0x60] sm:$0xff] %vm1655_vm8, %v1395_v50  ;;  %1509 = vperm.xlu0 %2769, %v1395_v50   ;;  %v1350_v34 = vld [vmem:[#allocation4 + $0x78] sm:$0xff] }
 0x52c   : > { %v1439_v56 = vmul.f32 1.442695, %v1411_v57 }
 0x52e   : > { %2799 = vpow2.f32 %v1439_v56  ;;  %v1380_v55 = vpop.xlane.xlu1 %1379 }
 0x52f   : > { %v1397_v54 = vmax.f32 %v1349_v10, %v1380_v55  ;;  %2801 = vpow2.f32 %v1419_v7  ;;  %v1423_v7 = vmul.f32 1.442695, %v1403_v14  ;;  %v1441_v14 = vmul.f32 1.442695, %v1412_v52 }
 0x530   : > { %2803 = vpow2.f32 %v1425_v61 }
 0x531   : > { %1919 = vst.msk [vmem:[#allocation4 + $0x70] sm:$0xff] %vm1655_vm8, %v1397_v54  ;;  %1519 = vperm.xlu2 %2768, %v1397_v54   ;;  %2805 = vpow2.f32 %v1431_v21 }
 0x532   : > { %1852 = vmatmul.bf16.gmra.mxu3 %v1788_v27  ;;  %v1673_v27 = vld [vmem:[#allocation6 + $0x8] sm:$0xff] }
 0x534   : > { %v3622_v49 = vpop.eup %2799 }
 0x535   : > { %1750 = vperm.xlu1 %2770, %v3622_v49   ;;  %v3628_v1 = vpop.eup %2801 }
 0x536   : > { %v3635_v43 = vpop.eup %2803 }
 0x537   : > { %v3642_v30 = vpop.eup %2805 }
 0x539   : > { %1700 = vperm.xlu2 %2768, %v3628_v1  }
 0x53a   : > { %v1500_v3 = vpop.permute.xlu0 %1499 }
 0x53b   : > { %v1537_v25 = vsub.f32 %v3411_v58, %v1500_v3  ;;  %v1413_v58 = vsub.f32 %v1349_v10, %v1397_v54  ;;  %v1435_v54 = vmul.f32 1.442695, %v3916_v15 }
 0x53d   : > { %v1563_v39 = vmul.f32 1.442695, %v1537_v25  ;;  %v1443_v36 = vmul.f32 1.442695, %v1413_v58 }
 0x53f   : > { %2807 = vpow2.f32 %v1563_v39 }
 0x541   : > { %1715 = vperm.xlu2 %2768, %v3635_v43  }
 0x542   : > { %v1505_v17 = vpop.permute.xlu0 %1504 }
 0x543   : > { %v1538_v19 = vsub.f32 %v3414_v59, %v1505_v17 }
 0x545   : > { %v1565_v20 = vmul.f32 1.442695, %v1538_v19  ;;  %v3645_v32 = vpop.eup %2807 }
 0x547   : > { %2809 = vpow2.f32 %v1565_v20 }
 0x548   : > { %2811 = vpow2.f32 %v1437_v48 }
 0x549   : > { %1730 = vperm.xlu2 %2768, %v3642_v30   ;;  %2813 = vpow2.f32 %v1443_v36 }
 0x54a   : > { %2815 = vpow2.f32 %v1415_v44 }
 0x54d   : > { %v3647_v33 = vpop.eup %2809 }
 0x54e   : > { %v1789_v59 = vpack.c.bf16 %v3647_v33, %v3645_v32  ;;  %v3654_v47 = vpop.eup %2811 }
 0x54f   : > { %v1382_v46 = vpop.xlane.xlu2 %1381  ;;  %v3661_v2 = vpop.eup %2813 }
 0x550   : > { %v1398_v50 = vmax.f32 %v1350_v34, %v1382_v46  ;;  %1857 = vmatmul.bf16.gmra.mxu3 %v1789_v59  ;;  %v3663_v4 = vpop.eup %2815 }
 0x551   : > { %1745 = vperm.xlu2 %2768, %v3654_v47  }
 0x552   : > { %v1414_v57 = vsub.f32 %v1350_v34, %v1398_v50  ;;  %1920 = vst.msk [vmem:[#allocation4 + $0x78] sm:$0xff] %vm1655_vm8, %v1398_v50  ;;  %1524 = vperm.xlu0 %2769, %v1398_v50  }
 0x554   : > { %v1445_v56 = vmul.f32 1.442695, %v1414_v57 }
 0x556   : > { %2817 = vpow2.f32 %v1445_v56 }
 0x557   : > { %2819 = vpow2.f32 %v1421_v62  ;;  %v1680_v62 = vld [vmem:[#allocation6 + $0x40] sm:$0xff] }
 0x558   : > { %2821 = vpow2.f32 %v1423_v7 }
 0x559   : > { %1760 = vperm.xlu2 %2768, %v3661_v2   ;;  %2823 = vpow2.f32 %v1429_v6 }
 0x55a   : > { %1690 = vperm.xlu0 %2769, %v3663_v4   ;;  %2825 = vpow2.f32 %v1435_v54 }
 0x55b   : > { %2827 = vpow2.f32 %v1441_v14  ;;  %v1681_v14 = vld [vmem:[#allocation6 + $0x48] sm:$0xff] }
 0x55c   : > { %v3667_v10 = vpop.eup %2817 }
 0x55d   : > { %1765 = vperm.xlu1 %2770, %v3667_v10   ;;  %v3673_v55 = vpop.eup %2819 }
 0x55e   : > { %v3679_v12 = vpop.eup %2821 }
 0x55f   : > { %v3685_v5 = vpop.eup %2823 }
 0x560   : > { %v3693_v26 = vpop.eup %2825 }
 0x561   : > { %v3696_v29 = vpop.eup %2827 }
 0x562   : > { %1705 = vperm.xlu0 %2769, %v3673_v55  }
 0x56a   : > { %1710 = vperm.xlu0 %2769, %v3679_v12  }
 0x572   : > { %1725 = vperm.xlu0 %2769, %v3685_v5  }
 0x575   : > { %v3688_v9 = vpop.f32.mrf.mxu3 }
 0x57a   : > { %1740 = vperm.xlu0 %2769, %v3693_v26  }
 0x57d   : > { %v1835_v28 = vpop.f32.mrf.mxu3 }
 0x582   : > { %1611 = vadd.xlane.f32.xlu2 %v3561_v11  ;;  %1755 = vperm.xlu0 %2769, %v3696_v29   ;;  %v1674_v11 = vld [vmem:[#allocation6 + $0x10] sm:$0xff] }
 0x583   : > { %v1515_v40 = vpop.permute.xlu1 %1514 }
 0x584   : > { %v1540_v21 = vsub.f32 %v3518_v38, %v1515_v40 }
 0x585   : > { %v1838_v42 = vpop.f32.mrf.mxu3 }
 0x586   : > { %v1569_v17 = vmul.f32 1.442695, %v1540_v21 }
 0x587   : > { %1609 = vadd.xlane.f32.xlu1 %v3553_v35 }
 0x588   : > { %2829 = vpow2.f32 %v1569_v17  ;;  %v1683_v17 = vld [vmem:[#allocation6 + $0x58] sm:$0xff] }
 0x58a   : > { %1615 = vadd.xlane.f32.xlu2 %v3574_v0 }
 0x58b   : > { %v1520_v41 = vpop.permute.xlu2 %1519  ;;  %v1696_v51 = vpop.permute.xlu1 %1695 }
 0x58c   : > { %v1769_v52 = vmul.f32 %v1696_v51, %v1673_v27  ;;  %v1541_v19 = vsub.f32 %v3541_v53, %v1520_v41 }
 0x58d   : > { %v3702_v61 = vpop.f32.mrf.mxu3 }
 0x58e   : > { %v1874_v3 = vadd.f32 %v1835_v28, %v1769_v52  ;;  %v2830_v53 = vpop.eup %2829 }
 0x58f   : > { %1617 = vadd.xlane.f32.xlu1 %v3569_v45  ;;  %v1677_v45 = vld [vmem:[#allocation6 + $0x28] sm:$0xff] }
 0x590   : > { %1890 = vst.msk [vmem:[#allocation6 + $0x8] sm:$0xff] %vm1099_vm7, %v1874_v3 }
 0x592   : > { %1621 = vadd.xlane.f32.xlu2 %v3594_v23  ;;  %v1571_v23 = vmul.f32 1.442695, %v1541_v19 }
 0x593   : > { %v1701_v25 = vpop.permute.xlu2 %1700  ;;  %v1721_v44 = vpop.permute.xlu1 %1720 }
 0x594   : > { %v1770_v35 = vmul.f32 %v1701_v25, %v1674_v11  ;;  %2831 = vpow2.f32 %v1571_v23 }
 0x595   : > { %v3708_v39 = vpop.f32.mrf.mxu3 }
 0x596   : > { %v1875_v0 = vadd.f32 %v1838_v42, %v1770_v35 }
 0x597   : > { %1623 = vadd.xlane.f32.xlu1 %v3617_v13  ;;  %v1678_v13 = vld [vmem:[#allocation6 + $0x30] sm:$0xff] }
 0x598   : > { %1891 = vst.msk [vmem:[#allocation6 + $0x10] sm:$0xff] %vm1099_vm7, %v1875_v0 }
 0x59a   : > { %1627 = vadd.xlane.f32.xlu2 %v3645_v32  ;;  %v1774_v32 = vmul.f32 %v1721_v44, %v1678_v13  ;;  %v2832_v50 = vpop.eup %2831  ;;  %v1682_v13 = vld [vmem:[#allocation6 + $0x50] sm:$0xff] }
 0x59b   : > { %v1716_v20 = vpop.permute.xlu2 %1715  ;;  %v1736_v28 = vpop.permute.xlu1 %1735 }
 0x59c   : > { %v1773_v48 = vmul.f32 %v1716_v20, %v1677_v45  ;;  %v1510_v38 = vpop.permute.xlu0 %1509  ;;  %v1777_v40 = vmul.f32 %v1736_v28, %v1681_v14  ;;  %v1676_v20 = vld [vmem:[#allocation6 + $0x20] sm:$0xff] }
 0x59d   : > { %v1539_v58 = vsub.f32 %v3502_v22, %v1510_v38  ;;  %v1845_v34 = vpop.f32.mrf.mxu3 }
 0x59e   : > { %v1878_v36 = vadd.f32 %v1845_v34, %v1773_v48  ;;  %v1679_v34 = vld [vmem:[#allocation6 + $0x38] sm:$0xff] }
 0x59f   : > { %v1567_v59 = vmul.f32 1.442695, %v1539_v58  ;;  %1629 = vadd.xlane.f32.xlu1 %v3647_v33 }
 0x5a0   : > { %1894 = vst.msk [vmem:[#allocation6 + $0x28] sm:$0xff] %vm1099_vm7, %v1878_v36 }
 0x5a1   : > { %2833 = vpow2.f32 %v1567_v59 }
 0x5a2   : > { %1633 = vadd.xlane.f32.xlu2 %v2830_v53 }
 0x5a3   : > { %v1731_v7 = vpop.permute.xlu2 %1730 }
 0x5a4   : > { %v1776_v6 = vmul.f32 %v1731_v7, %v1680_v62 }
 0x5a5   : > { %v1848_v46 = vpop.f32.mrf.mxu3 }
 0x5a6   : > { %v1879_v57 = vadd.f32 %v1848_v46, %v1774_v32 }
 0x5a7   : > { %v2834_v56 = vpop.eup %2833  ;;  %1635 = vadd.xlane.f32.xlu1 %v2832_v50 }
 0x5a8   : > { %1895 = vst.msk [vmem:[#allocation6 + $0x30] sm:$0xff] %vm1099_vm7, %v1879_v57  ;;  %v1790_v22 = vpack.c.bf16 %v2830_v53, %v2834_v56  ;;  %v1577_v57 = vld [vmem:[#allocation5 + $0x10] sm:$0xff] }
 0x5aa   : > { %1862 = vmatmul.bf16.gmra.mxu3 %v1790_v22 }
 0x5ac   : > { %1607 = vadd.xlane.f32.xlu0 %v3551_v31 }
 0x5ad   : > { %v1850_v33 = vpop.f32.mrf.mxu3 }
 0x5b4   : > { %1613 = vadd.xlane.f32.xlu0 %v3559_v8  ;;  %v1672_v8 = vld [vmem:[#allocation6] sm:$0xff] }
 0x5b5   : > { %v1853_v15 = vpop.f32.mrf.mxu3 }
 0x5b6   : > { %v1881_v54 = vadd.f32 %v1853_v15, %v1776_v6  ;;  %v1579_v6 = vld [vmem:[#allocation5 + $0x20] sm:$0xff] }
 0x5b7   : > { %v1595_v14 = vmul.f32 %v3679_v12, %v1579_v6 }
 0x5b8   : > { %1897 = vst.msk [vmem:[#allocation6 + $0x40] sm:$0xff] %vm1099_vm7, %v1881_v54 }
 0x5bc   : > { %1619 = vadd.xlane.f32.xlu0 %v3599_v63  ;;  %v1675_v63 = vld [vmem:[#allocation6 + $0x18] sm:$0xff] }
 0x5bd   : > { %v1855_v42 = vpop.f32.mrf.mxu3 }
 0x5be   : > { %v1882_v27 = vadd.f32 %v1855_v42, %v1777_v40  ;;  %v1580_v42 = vld [vmem:[#allocation5 + $0x28] sm:$0xff] }
 0x5c0   : > { %1898 = vst.msk [vmem:[#allocation6 + $0x48] sm:$0xff] %vm1099_vm7, %v1882_v27  ;;  %v1582_v27 = vld [vmem:[#allocation5 + $0x38] sm:$0xff] }
 0x5c4   : > { %1625 = vadd.xlane.f32.xlu0 %v3612_v18  ;;  %v1525_v31 = vpop.permute.xlu0 %1524 }
 0x5c5   : > { %v1542_v41 = vsub.f32 %v3546_v60, %v1525_v31  ;;  %v1746_v60 = vpop.permute.xlu2 %1745 }
 0x5c6   : > { %v1779_v45 = vmul.f32 %v1746_v60, %v1683_v17 }
 0x5c7   : > { %v1573_v51 = vmul.f32 1.442695, %v1542_v41 }
 0x5c9   : > { %2835 = vpow2.f32 %v1573_v51  ;;  %v1598_v51 = vmul.f32 %v3685_v5, %v1582_v27 }
 0x5cc   : > { %1631 = vadd.xlane.f32.xlu0 %v2834_v56  ;;  %v1691_v52 = vpop.permute.xlu0 %1690  ;;  %v1593_v56 = vmul.f32 %v3628_v1, %v1577_v57  ;;  %v1596_v1 = vmul.f32 %v3635_v43, %v1580_v42 }
 0x5cd   : > { %v1768_v3 = vmul.f32 %v1691_v52, %v1672_v8  ;;  %v3735_v32 = vpop.permute.xlu2 %1760  ;;  %v1583_v52 = vld [vmem:[#allocation5 + $0x40] sm:$0xff] }
 0x5ce   : > { %v1599_v12 = vmul.f32 %v3642_v30, %v1583_v52 }
 0x5cf   : > { %v2836_v11 = vpop.eup %2835  ;;  %v1873_v21 = vadd.f32 %v3688_v9, %v1768_v3  ;;  %v1585_v3 = vld [vmem:[#allocation5 + $0x50] sm:$0xff] }
 0x5d0   : > { %v1791_v25 = vpack.c.bf16 %v2836_v11, %v2832_v50 }
 0x5d1   : > { %1889 = vst.msk [vmem:[#allocation6] sm:$0xff] %vm1099_vm7, %v1873_v21 }
 0x5d2   : > { %1867 = vmatmul.bf16.gmra.mxu3 %v1791_v25  ;;  %v1601_v25 = vmul.f32 %v3693_v26, %v1585_v3 }
 0x5d3   : > { %v1858_v35 = vpop.f32.mrf.mxu3 }
 0x5d4   : > { %1637 = vadd.xlane.f32.xlu0 %v2836_v11  ;;  %v1706_v18 = vpop.permute.xlu0 %1705 }
 0x5d5   : > { %v1771_v0 = vmul.f32 %v1706_v18, %v1675_v63  ;;  %v1588_v18 = vld [vmem:[#allocation5 + $0x68] sm:$0xff] }
 0x5d6   : > { %v1604_v60 = vmul.f32 %v3696_v29, %v1588_v18  ;;  %v1578_v29 = vld [vmem:[#allocation5 + $0x18] sm:$0xff] }
 0x5d7   : > { %v1876_v19 = vadd.f32 %v3702_v61, %v1771_v0  ;;  %v3733_v61 = vpop.permute.xlu1 %1750 }
 0x5d9   : > { %1892 = vst.msk [vmem:[#allocation6 + $0x18] sm:$0xff] %vm1099_vm7, %v1876_v19 }
 0x5db   : > { %v1860_v23 = vpop.f32.mrf.mxu3 }
 0x5dc   : > { %v1884_v48 = vadd.f32 %v1860_v23, %v1779_v45  ;;  %v1711_v9 = vpop.permute.xlu0 %1710  ;;  %v1589_v45 = vld [vmem:[#allocation5 + $0x70] sm:$0xff] }
 0x5dd   : > { %v1772_v38 = vmul.f32 %v1711_v9, %v1676_v20  ;;  %v1605_v20 = vmul.f32 %v3661_v2, %v1589_v45  ;;  %v1575_v9 = vld [vmem:[#allocation5] sm:$0xff]  ;;  %v1581_v2 = vld [vmem:[#allocation5 + $0x30] sm:$0xff] }
 0x5de   : > { %1900 = vst.msk [vmem:[#allocation6 + $0x58] sm:$0xff] %vm1099_vm7, %v1884_v48 }
 0x5df   : > { %v1877_v58 = vadd.f32 %v3708_v39, %v1772_v38  ;;  %v3738_v39 = vpop.permute.xlu1 %1765 }
 0x5e1   : > { %1893 = vst.msk [vmem:[#allocation6 + $0x20] sm:$0xff] %vm1099_vm7, %v1877_v58 }
 0x5e4   : > { %v1726_v36 = vpop.permute.xlu0 %1725 }
 0x5e5   : > { %v1775_v59 = vmul.f32 %v1726_v36, %v1679_v34  ;;  %v1594_v34 = vmul.f32 %v3673_v55, %v1578_v29  ;;  %v1584_v55 = vld [vmem:[#allocation5 + $0x48] sm:$0xff] }
 0x5e7   : > { %v1880_v53 = vadd.f32 %v1850_v33, %v1775_v59  ;;  %v1576_v33 = vld [vmem:[#allocation5 + $0x8] sm:$0xff] }
 0x5e8   : > { %v1592_v7 = vmul.f32 %v3591_v16, %v1576_v33 }
 0x5e9   : > { %1896 = vst.msk [vmem:[#allocation6 + $0x38] sm:$0xff] %vm1099_vm7, %v1880_v53  ;;  %v1684_v53 = vld [vmem:[#allocation6 + $0x60] sm:$0xff] }
 0x5ec   : > { %v1741_v44 = vpop.permute.xlu0 %1740 }
 0x5ed   : > { %v1778_v46 = vmul.f32 %v1741_v44, %v1682_v13  ;;  %v1780_v13 = vmul.f32 %v3733_v61, %v1684_v53 }
 0x5ef   : > { %v1883_v50 = vadd.f32 %v1858_v35, %v1778_v46  ;;  %v1586_v35 = vld [vmem:[#allocation5 + $0x58] sm:$0xff] }
 0x5f0   : > { %v1602_v5 = vmul.f32 %v3654_v47, %v1586_v35  ;;  %v1591_v47 = vmul.f32 %v3663_v4, %v1575_v9 }
 0x5f1   : > { %1899 = vst.msk [vmem:[#allocation6 + $0x50] sm:$0xff] %vm1099_vm7, %v1883_v50  ;;  %v1597_v50 = vmul.f32 %v3602_v24, %v1581_v2  ;;  %v1587_v24 = vld [vmem:[#allocation5 + $0x60] sm:$0xff] }
 0x5f4   : > { %v1756_v26 = vpop.permute.xlu0 %1755 }
 0x5f5   : > { %v1612_v22 = vpop.xlane.xlu2 %1611 }
 0x5f6   : > { %v1641_v62 = vadd.f32 %v1612_v22, %v1593_v56  ;;  %v1685_v56 = vld [vmem:[#allocation6 + $0x68] sm:$0xff] }
 0x5f7   : > { %v1781_v22 = vmul.f32 %v1756_v26, %v1685_v56 }
 0x5f8   : > { %1658 = vst.msk [vmem:[#allocation5 + $0x10] sm:$0xff] %vm1655_vm8, %v1641_v62 }
 0x5fa   : > { %v1610_v15 = vpop.xlane.xlu1 %1609 }
 0x5fb   : > { %v1640_v54 = vadd.f32 %v1610_v15, %v1592_v7  ;;  %v1600_v7 = vmul.f32 %v3608_v37, %v1584_v55  ;;  %v1603_v15 = vmul.f32 %v3622_v49, %v1587_v24  ;;  %v1686_v37 = vld [vmem:[#allocation6 + $0x70] sm:$0xff] }
 0x5fc   : > { %v1782_v27 = vmul.f32 %v3735_v32, %v1686_v37 }
 0x5fd   : > { %1657 = vst.msk [vmem:[#allocation5 + $0x8] sm:$0xff] %vm1655_vm8, %v1640_v54  ;;  %v1616_v28 = vpop.xlane.xlu2 %1615 }
 0x5fe   : > { %v1643_v40 = vadd.f32 %v1616_v28, %v1595_v14  ;;  %v1590_v28 = vld [vmem:[#allocation5 + $0x78] sm:$0xff] }
 0x600   : > { %1660 = vst.msk [vmem:[#allocation5 + $0x20] sm:$0xff] %vm1655_vm8, %v1643_v40  ;;  %v1606_v40 = vmul.f32 %v3667_v10, %v1590_v28 }
 0x602   : > { %v1618_v31 = vpop.xlane.xlu1 %1617 }
 0x603   : > { %v1644_v41 = vadd.f32 %v1618_v31, %v1596_v1 }
 0x605   : > { %1661 = vst.msk [vmem:[#allocation5 + $0x28] sm:$0xff] %vm1655_vm8, %v1644_v41  ;;  %v1622_v16 = vpop.xlane.xlu2 %1621 }
 0x606   : > { %v1646_v8 = vadd.f32 %v1622_v16, %v1598_v51  ;;  %v1687_v51 = vld [vmem:[#allocation6 + $0x78] sm:$0xff] }
 0x607   : > { %v1783_v49 = vmul.f32 %v3738_v39, %v1687_v51 }
 0x608   : > { %1663 = vst.msk [vmem:[#allocation5 + $0x38] sm:$0xff] %vm1655_vm8, %v1646_v8 }
 0x60a   : > { %v1624_v11 = vpop.xlane.xlu1 %1623 }
 0x60b   : > { %v1647_v21 = vadd.f32 %v1624_v11, %v1599_v12 }
 0x60d   : > { %1664 = vst.msk [vmem:[#allocation5 + $0x40] sm:$0xff] %vm1655_vm8, %v1647_v21  ;;  %v1628_v43 = vpop.xlane.xlu2 %1627 }
 0x60e   : > { %v1649_v63 = vadd.f32 %v1628_v43, %v1601_v25 }
 0x610   : > { %1666 = vst.msk [vmem:[#allocation5 + $0x50] sm:$0xff] %vm1655_vm8, %v1649_v63 }
 0x612   : > { %v1630_v0 = vpop.xlane.xlu1 %1629 }
 0x613   : > { %v1650_v17 = vadd.f32 %v1630_v0, %v1602_v5 }
 0x615   : > { %1667 = vst.msk [vmem:[#allocation5 + $0x58] sm:$0xff] %vm1655_vm8, %v1650_v17  ;;  %v1634_v30 = vpop.xlane.xlu2 %1633 }
 0x616   : > { %v1652_v19 = vadd.f32 %v1634_v30, %v1604_v60 }
 0x618   : > { %1669 = vst.msk [vmem:[#allocation5 + $0x68] sm:$0xff] %vm1655_vm8, %v1652_v19 }
 0x61a   : > { %v1636_v23 = vpop.xlane.xlu1 %1635 }
 0x61b   : > { %v1653_v48 = vadd.f32 %v1636_v23, %v1605_v20 }
 0x61d   : > { %1670 = vst.msk [vmem:[#allocation5 + $0x70] sm:$0xff] %vm1655_vm8, %v1653_v48 }
 0x61f   : > { %v1608_v38 = vpop.xlane.xlu0 %1607 }
 0x620   : > { %v1639_v58 = vadd.f32 %v1608_v38, %v1591_v47 }
 0x622   : > { %1656 = vst.msk [vmem:[#allocation5] sm:$0xff] %vm1655_vm8, %v1639_v58 }
 0x627   : > { %v1614_v36 = vpop.xlane.xlu0 %1613 }
 0x628   : > { %v1642_v59 = vadd.f32 %v1614_v36, %v1594_v34 }
 0x62a   : > { %1659 = vst.msk [vmem:[#allocation5 + $0x18] sm:$0xff] %vm1655_vm8, %v1642_v59 }
 0x62d   : > { %v1863_v44 = vpop.f32.mrf.mxu3 }
 0x62e   : > { %v1885_v46 = vadd.f32 %v1863_v44, %v1780_v13 }
 0x62f   : > { %v1620_v4 = vpop.xlane.xlu0 %1619 }
 0x630   : > { %1901 = vst.msk [vmem:[#allocation6 + $0x60] sm:$0xff] %vm1099_vm7, %v1885_v46  ;;  %v1645_v57 = vadd.f32 %v1620_v4, %v1597_v50 }
 0x632   : > { %1662 = vst.msk [vmem:[#allocation5 + $0x30] sm:$0xff] %vm1655_vm8, %v1645_v57 }
 0x635   : > { %v1865_v62 = vpop.f32.mrf.mxu3 }
 0x636   : > { %v1886_v33 = vadd.f32 %v1865_v62, %v1781_v22 }
 0x637   : > { %v1626_v6 = vpop.xlane.xlu0 %1625 }
 0x638   : > { %1902 = vst.msk [vmem:[#allocation6 + $0x68] sm:$0xff] %vm1099_vm7, %v1886_v33  ;;  %v1648_v61 = vadd.f32 %v1626_v6, %v1600_v7 }
 0x63a   : > { %1665 = vst.msk [vmem:[#allocation5 + $0x48] sm:$0xff] %vm1655_vm8, %v1648_v61 }
 0x63f   : > { %v1632_v54 = vpop.xlane.xlu0 %1631 }
 0x640   : > { %v1651_v14 = vadd.f32 %v1632_v54, %v1603_v15 }
 0x642   : > { %1668 = vst.msk [vmem:[#allocation5 + $0x60] sm:$0xff] %vm1655_vm8, %v1651_v14 }
 0x647   : > { %v1638_v42 = vpop.xlane.xlu0 %1637 }
 0x648   : > { %v1654_v1 = vadd.f32 %v1638_v42, %v1606_v40 }
 0x64a   : > { %1671 = vst.msk [vmem:[#allocation5 + $0x78] sm:$0xff] %vm1655_vm8, %v1654_v1 }
 0x655   : > { %v1868_v31 = vpop.f32.mrf.mxu3 }
 0x656   : > { %v1887_v41 = vadd.f32 %v1868_v31, %v1782_v27 }
 0x658   : > { %1903 = vst.msk [vmem:[#allocation6 + $0x70] sm:$0xff] %vm1099_vm7, %v1887_v41 }
 0x65c   : > { %1924 = sbr.rel (%p2617_p10) target bundleno = 2167 (0x877), region = 76 }
 0x65d   : > { %v1870_v16 = vpop.f32.mrf.mxu3 }
 0x65e   : > { %v1888_v8 = vadd.f32 %v1870_v16, %v1783_v49 }
 0x660   : > { %1904 = vst.msk [vmem:[#allocation6 + $0x78] sm:$0xff] %vm1099_vm7, %v1888_v8 }
 0x661   : > { %v1927_v10 = vld [vmem:[#allocation5 + $0x10] sm:$0xff]  ;;  %v1925_v52 = vld [vmem:[#allocation5] sm:$0xff]  ;;  %v2934_v12 = vmov 0   ;;  %v1928_v32 = vld [vmem:[#allocation5 + $0x18] sm:$0xff] }
 0x662   : > { %2838 = vset.pattern.permute.xlu1 %v2934_v12  ;;  %2837 = vset.pattern.permute.xlu0 %v2934_v12  ;;  %2842 = vrcp.f32 %v1927_v10  ;;  %v1929_v3 = vld [vmem:[#allocation5 + $0x20] sm:$0xff]  ;;  %v1926_v11 = vld [vmem:[#allocation5 + $0x8] sm:$0xff]  ;;  %v1932_v63 = vld [vmem:[#allocation5 + $0x38] sm:$0xff] }
 0x663   : > { %2844 = vrcp.f32 %v1925_v52  ;;  %2839 = vset.pattern.permute.xlu2 %v2934_v12  ;;  %v1930_v25 = vld [vmem:[#allocation5 + $0x28] sm:$0xff]  ;;  %v1931_v5 = vld [vmem:[#allocation5 + $0x30] sm:$0xff]  ;;  %v1933_v0 = vld [vmem:[#allocation5 + $0x40] sm:$0xff] }
 0x664   : > { %2846 = vrcp.f32 %v1928_v32  ;;  %v1935_v60 = vld [vmem:[#allocation5 + $0x50] sm:$0xff]  ;;  %v1934_v19 = vld [vmem:[#allocation5 + $0x48] sm:$0xff]  ;;  %v1936_v26 = vld [vmem:[#allocation5 + $0x58] sm:$0xff] }
 0x665   : > { %2848 = vrcp.f32 %v1929_v3  ;;  %v1938_v23 = vld [vmem:[#allocation5 + $0x68] sm:$0xff]  ;;  %v1937_v9 = vld [vmem:[#allocation5 + $0x60] sm:$0xff]  ;;  %v1939_v38 = vld [vmem:[#allocation5 + $0x70] sm:$0xff] }
 0x666   : > { %2850 = vrcp.f32 %v1926_v11  ;;  %v1940_v34 = vld [vmem:[#allocation5 + $0x78] sm:$0xff]  ;;  %v2673_v2 = vld [vmem:[%s3902_s8 + $0x8] sm:$0xff]  ;;  %v2672_v13 = vld [vmem:[%s3902_s8] sm:$0xff] }
 0x667   : > { %2852 = vrcp.f32 %v1930_v25  ;;  %2159 = vmatpush.bf16.msra.mxu0 %v2673_v2  ;;  %2699 = vmatpush.bf16.msra.mxu3 %v2673_v2  ;;  %v1973_v57 = vld [vmem:[#allocation6] sm:$0xff]  ;;  %v1974_v56 = vld [vmem:[#allocation6 + $0x8] sm:$0xff]  ;;  %v1984_v40 = vld [vmem:[#allocation6 + $0x58] sm:$0xff] }
 0x668   : > { %v2843_v39 = vpop.eup %2842  ;;  %2854 = vrcp.f32 %v1932_v63  ;;  %v1957_v33 = vld [vmem:[#allocation2] sm:$0xff]  ;;  %v1958_v7 = vld [vmem:[#allocation2 + $0x8] sm:$0xff]  ;;  %v1975_v1 = vld [vmem:[#allocation6 + $0x10] sm:$0xff] }
 0x669   : > { %v2845_v21 = vpop.eup %2844  ;;  %2001 = vperm.xlu1 %2838, %v2843_v39   ;;  %2856 = vrcp.f32 %v1931_v5  ;;  %v1976_v37 = vld [vmem:[#allocation6 + $0x18] sm:$0xff]  ;;  %v1983_v49 = vld [vmem:[#allocation6 + $0x50] sm:$0xff]  ;;  %v1986_v63 = vld [vmem:[#allocation6 + $0x68] sm:$0xff] }
 0x66a   : > { %1991 = vperm.xlu0 %2837, %v2845_v21   ;;  %v2847_v43 = vpop.eup %2846  ;;  %2858 = vrcp.f32 %v1933_v0  ;;  %v1968_v51 = vld [vmem:[#allocation2 + $0x58] sm:$0xff]  ;;  %v1959_v16 = vld [vmem:[#allocation2 + $0x10] sm:$0xff]  ;;  %v1985_v5 = vld [vmem:[#allocation6 + $0x60] sm:$0xff] }
 0x66b   : > { %v2849_v35 = vpop.eup %2848  ;;  %2860 = vrcp.f32 %v1935_v60  ;;  %2160 = vmatpush.bf16.msra.mxu0 %v2672_v13  ;;  %2700 = vmatpush.bf16.msra.mxu3 %v2672_v13  ;;  %v1960_v8 = vld [vmem:[#allocation2 + $0x18] sm:$0xff]  ;;  %v1967_v10 = vld [vmem:[#allocation2 + $0x50] sm:$0xff]  ;;  %v1977_v0 = vld [vmem:[#allocation6 + $0x20] sm:$0xff] }
 0x66c   : > { %v2851_v18 = vpop.eup %2850  ;;  %2011 = vperm.xlu2 %2839, %v2849_v35   ;;  %2862 = vrcp.f32 %v1934_v19  ;;  %v1979_v2 = vld [vmem:[#allocation6 + $0x30] sm:$0xff] }
 0x66d   : > { %v2853_v17 = vpop.eup %2852  ;;  %2864 = vrcp.f32 %v1936_v26  ;;  %v1970_v26 = vld [vmem:[#allocation2 + $0x68] sm:$0xff]  ;;  %v1987_v13 = vld [vmem:[#allocation6 + $0x70] sm:$0xff] }
 0x66e   : > { %v2855_v30 = vpop.eup %2854  ;;  %2866 = vrcp.f32 %v1938_v23  ;;  %v1961_v23 = vld [vmem:[#allocation2 + $0x20] sm:$0xff] }
 0x66f   : > { %v2857_v45 = vpop.eup %2856  ;;  %2868 = vrcp.f32 %v1937_v9 }
 0x670   : > { %v2859_v20 = vpop.eup %2858  ;;  %2870 = vrcp.f32 %v1939_v38 }
 0x671   : > { %2006 = vperm.xlu1 %2838, %v2847_v43   ;;  %v2861_v48 = vpop.eup %2860  ;;  %2872 = vrcp.f32 %v1940_v34 }
 0x672   : > { %1996 = vperm.xlu0 %2837, %v2851_v18   ;;  %v2863_v47 = vpop.eup %2862 }
 0x673   : > { %v2865_v58 = vpop.eup %2864 }
 0x674   : > { %2016 = vperm.xlu2 %2839, %v2853_v17   ;;  %v2867_v29 = vpop.eup %2866  ;;  %v1978_v17 = vld [vmem:[#allocation6 + $0x28] sm:$0xff] }
 0x675   : > { %v2869_v36 = vpop.eup %2868 }
 0x676   : > { %v2871_v59 = vpop.eup %2870 }
 0x677   : > { %v2873_v53 = vpop.eup %2872 }
 0x679   : > { %2026 = vperm.xlu1 %2838, %v2855_v30  }
 0x67a   : > { %2021 = vperm.xlu0 %2837, %v2857_v45  }
 0x67c   : > { %2031 = vperm.xlu2 %2839, %v2859_v20   ;;  %v1969_v20 = vld [vmem:[#allocation2 + $0x60] sm:$0xff] }
 0x681   : > { %2041 = vperm.xlu1 %2838, %v2861_v48   ;;  %v1962_v48 = vld [vmem:[#allocation2 + $0x28] sm:$0xff] }
 0x682   : > { %2036 = vperm.xlu0 %2837, %v2863_v47  }
 0x684   : > { %2046 = vperm.xlu2 %2839, %v2865_v58  }
 0x689   : > { %2056 = vperm.xlu1 %2838, %v2867_v29  }
 0x68a   : > { %2051 = vperm.xlu0 %2837, %v2869_v36   ;;  %v1988_v36 = vld [vmem:[#allocation6 + $0x78] sm:$0xff] }
 0x68c   : > { %2061 = vperm.xlu2 %2839, %v2871_v59  }
 0x692   : > { %2066 = vperm.xlu0 %2837, %v2873_v53   ;;  %v1980_v53 = vld [vmem:[#allocation6 + $0x38] sm:$0xff] }
 0x6c6   : > { %v2012_v44 = vpop.permute.xlu2 %2011 }
 0x6c7   : > { %v2073_v19 = vmul.f32 %v2012_v44, %v1977_v0 }
 0x6c9   : > { %v2089_v38 = vadd.f32 %v2073_v19, %v1961_v23 }
 0x6ce   : > { %v2017_v46 = vpop.permute.xlu2 %2016 }
 0x6cf   : > { %v2074_v45 = vmul.f32 %v2017_v46, %v1978_v17 }
 0x6d1   : > { %v2090_v58 = vadd.f32 %v2074_v45, %v1962_v48 }
 0x6d3   : > { %v2103_v34 = vpack.c.bf16 %v2090_v58, %v2089_v38 }
 0x6d6   : > { %v3786_v62 = vpop.permute.xlu2 %2031 }
 0x6db   : > { %v2002_v50 = vpop.permute.xlu1 %2001 }
 0x6dc   : > { %v1992_v4 = vpop.permute.xlu0 %1991  ;;  %v2071_v31 = vmul.f32 %v2002_v50, %v1975_v1  ;;  %v1965_v1 = vld [vmem:[#allocation2 + $0x40] sm:$0xff] }
 0x6dd   : > { %v2069_v55 = vmul.f32 %v1992_v4, %v1973_v57  ;;  %v1972_v57 = vld [vmem:[#allocation2 + $0x78] sm:$0xff] }
 0x6de   : > { %v2047_v42 = vpop.permute.xlu2 %2046  ;;  %v2087_v11 = vadd.f32 %v2071_v31, %v1959_v16  ;;  %v2674_v16 = vld [vmem:[%s3904_s10] sm:$0xff] }
 0x6df   : > { %v2085_v24 = vadd.f32 %v2069_v55, %v1957_v33  ;;  %v2080_v27 = vmul.f32 %v2047_v42, %v1984_v40  ;;  %v1963_v55 = vld [vmem:[#allocation2 + $0x30] sm:$0xff]  ;;  %v1981_v40 = vld [vmem:[#allocation6 + $0x40] sm:$0xff]  ;;  %v1982_v42 = vld [vmem:[#allocation6 + $0x48] sm:$0xff] }
 0x6e0   : > { %v1971_v33 = vld [vmem:[#allocation2 + $0x70] sm:$0xff] }
 0x6e1   : > { %v2096_v12 = vadd.f32 %v2080_v27, %v1968_v51  ;;  %v2677_v51 = vld [vmem:[%s3904_s10 + $0x18] sm:$0xff] }
 0x6e2   : > { %2322 = vmatpush.bf16.msra.mxu1 %v2677_v51  ;;  %2701 = vmatpush.bf16.msra.mxu2 %v2677_v51 }
 0x6e3   : > { %v2007_v22 = vpop.permute.xlu1 %2006 }
 0x6e4   : > { %v1997_v6 = vpop.permute.xlu0 %1996  ;;  %v2072_v41 = vmul.f32 %v2007_v22, %v1976_v37  ;;  %v1966_v37 = vld [vmem:[#allocation2 + $0x48] sm:$0xff] }
 0x6e5   : > { %v2070_v61 = vmul.f32 %v1997_v6, %v1974_v56  ;;  %v1964_v56 = vld [vmem:[#allocation2 + $0x38] sm:$0xff] }
 0x6e6   : > { %v2088_v39 = vadd.f32 %v2072_v41, %v1960_v8  ;;  %v2062_v44 = vpop.permute.xlu2 %2061 }
 0x6e7   : > { %v2086_v15 = vadd.f32 %v2070_v61, %v1958_v7  ;;  %v2083_v22 = vmul.f32 %v2062_v44, %v1987_v13 }
 0x6e8   : > { %v2102_v43 = vpack.c.bf16 %v2088_v39, %v2087_v11 }
 0x6e9   : > { %v2101_v54 = vpack.c.bf16 %v2086_v15, %v2085_v24  ;;  %v2099_v24 = vadd.f32 %v2083_v22, %v1971_v33 }
 0x6eb   : > { %2626 = vmatmul.msk.bf16.vlgmr.msra.gmra.mxu0 %vm1099_vm7, %v2101_v54  ;;  %v2027_v14 = vpop.permute.xlu1 %2026 }
 0x6ec   : > { %v2022_v28 = vpop.permute.xlu0 %2021  ;;  %v2076_v50 = vmul.f32 %v2027_v14, %v1980_v53  ;;  %v2077_v14 = vmul.f32 %v3786_v62, %v1981_v40  ;;  %v2675_v62 = vld [vmem:[%s3904_s10 + $0x8] sm:$0xff] }
 0x6ed   : > { %v2075_v4 = vmul.f32 %v2022_v28, %v1979_v2 }
 0x6ee   : > { %v2092_v6 = vadd.f32 %v2076_v50, %v1964_v56  ;;  %v2093_v27 = vadd.f32 %v2077_v14, %v1965_v1 }
 0x6ef   : > { %v2091_v61 = vadd.f32 %v2075_v4, %v1963_v55 }
 0x6f1   : > { %v2104_v54 = vpack.c.bf16 %v2092_v6, %v2091_v61 }
 0x6f3   : > { %v2042_v52 = vpop.permute.xlu1 %2041 }
 0x6f4   : > { %v2079_v32 = vmul.f32 %v2042_v52, %v1983_v49  ;;  %v2037_v3 = vpop.permute.xlu0 %2036  ;;  %v2676_v49 = vld [vmem:[%s3904_s10 + $0x10] sm:$0xff] }
 0x6f5   : > { %v2078_v28 = vmul.f32 %v2037_v3, %v1982_v42  ;;  %2323 = vmatpush.bf16.msra.mxu1 %v2676_v49  ;;  %2702 = vmatpush.bf16.msra.mxu2 %v2676_v49 }
 0x6f6   : > { %v2095_v21 = vadd.f32 %v2079_v32, %v1967_v10  ;;  %v3812_v10 = vld [vmem:[%s3903_s9] ss:$0 sm:$0xff] }
 0x6f7   : > { %v2094_v31 = vadd.f32 %v2078_v28, %v1966_v37 }
 0x6f8   : > { %v2106_v25 = vpack.c.bf16 %v2096_v12, %v2095_v21 }
 0x6f9   : > { %v2105_v41 = vpack.c.bf16 %v2094_v31, %v2093_v27  ;;  %2324 = vmatpush.bf16.msra.mxu1 %v2675_v62  ;;  %2703 = vmatpush.bf16.msra.mxu2 %v2675_v62 }
 0x6fa   : > { %2631 = vmatmul.msk.bf16.vlgmr.msra.gmra.mxu3 %vm1099_vm7, %v2106_v25 }
 0x6fb   : > { %2627 = vmatmul.msk.bf16.gmra.mxu0 %vm1099_vm7, %v2102_v43  ;;  %v2057_v35 = vpop.permute.xlu1 %2056 }
 0x6fc   : > { %v2052_v18 = vpop.permute.xlu0 %2051  ;;  %v2082_v60 = vmul.f32 %v2057_v35, %v1986_v63 }
 0x6fd   : > { %v2081_v30 = vmul.f32 %v2052_v18, %v1985_v5  ;;  %2325 = vmatpush.bf16.msra.mxu1 %v2674_v16  ;;  %2704 = vmatpush.bf16.msra.mxu2 %v2674_v16 }
 0x6fe   : > { %v2098_v9 = vadd.f32 %v2082_v60, %v1970_v26 }
 0x6ff   : > { %v2097_v47 = vadd.f32 %v2081_v30, %v1969_v20 }
 0x701   : > { %v2107_v29 = vpack.c.bf16 %v2098_v9, %v2097_v47 }
 0x704   : > { %v2067_v59 = vpop.permute.xlu0 %2066 }
 0x705   : > { %v2084_v46 = vmul.f32 %v2067_v59, %v1988_v36 }
 0x707   : > { %v2100_v7 = vadd.f32 %v2084_v46, %v1972_v57 }
 0x709   : > { %v2108_v15 = vpack.c.bf16 %v2100_v7, %v2099_v24 }
 0x70a   : > { %2632 = vmatmul.msk.bf16.gmra.mxu3 %vm1099_vm7, %v2107_v29 }
 0x70b   : > { %2628 = vmatmul.msk.bf16.gmra.mxu0 %vm1099_vm7, %v2103_v34 }
 0x71a   : > { %2633 = vmatmul.msk.bf16.gmra.mxu3 %vm1099_vm7, %v2108_v15 }
 0x71b   : > { %2629 = vmatmul.msk.bf16.gmra.mxu0 %vm1099_vm7, %v2104_v54 }
 0x72b   : > { %2630 = vmatmul.msk.bf16.gmra.mxu0 %vm1099_vm7, %v2105_v41 }
 0x768   : > { %v2162_v8 = vpop.f32.mrf.mxu0 }
 0x769   : > { %v2163_v52 = vadd.f32 %v3812_v10, %v2162_v8 }
 0x76b   : > { %v2218_v32 = vmul.f32 0.2, %v2163_v52  ;;  %vm2202_vm7 = vcmp.gt.f32.partialorder %v2163_v52, 0.0 }
 0x76d   : > { %v2234_v39 = vsel %vm2202_vm7, %v2163_v52, %v2218_v32 }
 0x770   : > { %v2164_v12 = vpop.f32.mrf.mxu0 }
 0x771   : > { %v2165_v3 = vadd.f32 %v3812_v10, %v2164_v12 }
 0x773   : > { %v2219_v11 = vmul.f32 0.2, %v2165_v3  ;;  %vm2203_vm9 = vcmp.gt.f32.partialorder %v2165_v3, 0.0 }
 0x775   : > { %v2235_v21 = vsel %vm2203_vm9, %v2165_v3, %v2219_v11  ;;  %vm2367_vm9 = vcmask 97280  }
 0x776   : > { %v2250_v25 = vpack.c.bf16 %v2235_v21, %v2234_v39 }
 0x778   : > { %v2167_v43 = vpop.f32.mrf.mxu0  ;;  %2650 = vmatmul.msk.bf16.vlgmr.msra.gmra.mxu1 %vm1237_vm6, %v2250_v25 }
 0x779   : > { %v2168_v63 = vadd.f32 %v3812_v10, %v2167_v43  ;;  %v2841_v43 = vld [vmem:[%s3905_s11] ss:$0 sm:$0xff] }
 0x77b   : > { %v2220_v5 = vmul.f32 0.2, %v2168_v63  ;;  %vm2204_vm10 = vcmp.gt.f32.partialorder %v2168_v63, 0.0 }
 0x77d   : > { %v2236_v17 = vsel %vm2204_vm10, %v2168_v63, %v2220_v5  ;;  %v2187_v44 = vpop.f32.mrf.mxu3 }
 0x77e   : > { %v2188_v54 = vadd.f32 %v3812_v10, %v2187_v44 }
 0x780   : > { %v2169_v35 = vpop.f32.mrf.mxu0  ;;  %v2228_v42 = vmul.f32 0.2, %v2188_v54  ;;  %vm2212_vm4 = vcmp.gt.f32.partialorder %v2188_v54, 0.0 }
 0x781   : > { %v2170_v18 = vadd.f32 %v3812_v10, %v2169_v35 }
 0x782   : > { %v2244_v1 = vsel %vm2212_vm4, %v2188_v54, %v2228_v42 }
 0x783   : > { %v2221_v0 = vmul.f32 0.2, %v2170_v18  ;;  %vm2205_vm11 = vcmp.gt.f32.partialorder %v2170_v18, 0.0 }
 0x785   : > { %v2237_v60 = vsel %vm2205_vm11, %v2170_v18, %v2221_v0  ;;  %v2189_v57 = vpop.f32.mrf.mxu3 }
 0x786   : > { %v2251_v30 = vpack.c.bf16 %v2237_v60, %v2236_v17  ;;  %v2190_v15 = vadd.f32 %v3812_v10, %v2189_v57 }
 0x788   : > { %v2172_v19 = vpop.f32.mrf.mxu0  ;;  %2651 = vmatmul.msk.bf16.gmra.mxu1 %vm1237_vm6, %v2251_v30  ;;  %v2229_v40 = vmul.f32 0.2, %v2190_v15  ;;  %vm2213_vm2 = vcmp.gt.f32.partialorder %v2190_v15, 0.0 }
 0x789   : > { %v2173_v45 = vadd.f32 %v3812_v10, %v2172_v19 }
 0x78a   : > { %v2245_v14 = vsel %vm2213_vm2, %v2190_v15, %v2229_v40 }
 0x78b   : > { %v2222_v20 = vmul.f32 0.2, %v2173_v45  ;;  %vm2206_vm12 = vcmp.gt.f32.partialorder %v2173_v45, 0.0  ;;  %v2255_v37 = vpack.c.bf16 %v2245_v14, %v2244_v1 }
 0x78d   : > { %v2238_v9 = vsel %vm2206_vm12, %v2173_v45, %v2222_v20  ;;  %v2192_v24 = vpop.f32.mrf.mxu3 }
 0x78e   : > { %v2193_v31 = vadd.f32 %v3812_v10, %v2192_v24 }
 0x790   : > { %v2174_v26 = vpop.f32.mrf.mxu0  ;;  %v2230_v49 = vmul.f32 0.2, %v2193_v31  ;;  %vm2214_vm5 = vcmp.gt.f32.partialorder %v2193_v31, 0.0 }
 0x791   : > { %v2175_v23 = vadd.f32 %v3812_v10, %v2174_v26 }
 0x792   : > { %v2246_v16 = vsel %vm2214_vm5, %v2193_v31, %v2230_v49 }
 0x793   : > { %v2223_v48 = vmul.f32 0.2, %v2175_v23  ;;  %vm2207_vm13 = vcmp.gt.f32.partialorder %v2175_v23, 0.0 }
 0x795   : > { %v2239_v47 = vsel %vm2207_vm13, %v2175_v23, %v2223_v48  ;;  %v2194_v28 = vpop.f32.mrf.mxu3 }
 0x796   : > { %v2252_v38 = vpack.c.bf16 %v2239_v47, %v2238_v9  ;;  %v2195_v27 = vadd.f32 %v3812_v10, %v2194_v28 }
 0x798   : > { %v2177_v58 = vpop.f32.mrf.mxu0  ;;  %2652 = vmatmul.msk.bf16.gmra.mxu1 %vm1237_vm6, %v2252_v38  ;;  %v2231_v51 = vmul.f32 0.2, %v2195_v27  ;;  %vm2215_vm3 = vcmp.gt.f32.partialorder %v2195_v27, 0.0 }
 0x799   : > { %v2178_v29 = vadd.f32 %v3812_v10, %v2177_v58 }
 0x79a   : > { %v2247_v62 = vsel %vm2215_vm3, %v2195_v27, %v2231_v51 }
 0x79b   : > { %v2224_v36 = vmul.f32 0.2, %v2178_v29  ;;  %vm2208_vm14 = vcmp.gt.f32.partialorder %v2178_v29, 0.0  ;;  %v2256_v8 = vpack.c.bf16 %v2247_v62, %v2246_v16 }
 0x79d   : > { %v2240_v2 = vsel %vm2208_vm14, %v2178_v29, %v2224_v36  ;;  %v2197_v41 = vpop.f32.mrf.mxu3 }
 0x79e   : > { %v2198_v32 = vadd.f32 %v3812_v10, %v2197_v41 }
 0x7a0   : > { %v2179_v34 = vpop.f32.mrf.mxu0  ;;  %v2232_v11 = vmul.f32 0.2, %v2198_v32  ;;  %vm2216_vm7 = vcmp.gt.f32.partialorder %v2198_v32, 0.0 }
 0x7a1   : > { %v2180_v59 = vadd.f32 %v3812_v10, %v2179_v34 }
 0x7a2   : > { %v2248_v21 = vsel %vm2216_vm7, %v2198_v32, %v2232_v11 }
 0x7a3   : > { %v2225_v53 = vmul.f32 0.2, %v2180_v59  ;;  %vm2209_vm15 = vcmp.gt.f32.partialorder %v2180_v59, 0.0 }
 0x7a5   : > { %v2241_v13 = vsel %vm2209_vm15, %v2180_v59, %v2225_v53  ;;  %v2199_v52 = vpop.f32.mrf.mxu3 }
 0x7a6   : > { %v2253_v46 = vpack.c.bf16 %v2241_v13, %v2240_v2  ;;  %v2200_v12 = vadd.f32 %v3812_v10, %v2199_v52 }
 0x7a8   : > { %v2182_v50 = vpop.f32.mrf.mxu0  ;;  %2653 = vmatmul.msk.bf16.gmra.mxu1 %vm1237_vm6, %v2253_v46  ;;  %v2233_v3 = vmul.f32 0.2, %v2200_v12  ;;  %vm2217_vm8 = vcmp.gt.f32.partialorder %v2200_v12, 0.0 }
 0x7a9   : > { %v2183_v4 = vadd.f32 %v3812_v10, %v2182_v50 }
 0x7aa   : > { %v2249_v39 = vsel %vm2217_vm8, %v2200_v12, %v2233_v3 }
 0x7ab   : > { %v2226_v55 = vmul.f32 0.2, %v2183_v4  ;;  %vm2210_vm0 = vcmp.gt.f32.partialorder %v2183_v4, 0.0  ;;  %v2257_v25 = vpack.c.bf16 %v2249_v39, %v2248_v21 }
 0x7ad   : > { %v2242_v7 = vsel %vm2210_vm0, %v2183_v4, %v2226_v55 }
 0x7b0   : > { %v2184_v56 = vpop.f32.mrf.mxu0 }
 0x7b1   : > { %v2185_v22 = vadd.f32 %v3812_v10, %v2184_v56 }
 0x7b3   : > { %v2227_v33 = vmul.f32 0.2, %v2185_v22  ;;  %vm2211_vm1 = vcmp.gt.f32.partialorder %v2185_v22, 0.0 }
 0x7b5   : > { %v2243_v6 = vsel %vm2211_vm1, %v2185_v22, %v2227_v33 }
 0x7b6   : > { %v2254_v61 = vpack.c.bf16 %v2243_v6, %v2242_v7 }
 0x7b8   : > { %2654 = vmatmul.msk.bf16.vlgmr.msra.gmra.mxu2 %vm1237_vm6, %v2254_v61 }
 0x7c8   : > { %2655 = vmatmul.msk.bf16.gmra.mxu2 %vm1237_vm6, %v2255_v37 }
 0x7d8   : > { %2656 = vmatmul.msk.bf16.gmra.mxu2 %vm1237_vm6, %v2256_v8 }
 0x7e8   : > { %2657 = vmatmul.msk.bf16.gmra.mxu2 %vm1237_vm6, %v2257_v25 }
 0x7f5   : > { %v2327_v63 = vpop.f32.mrf.mxu1 }
 0x7f6   : > { %v2328_v10 = vadd.f32 %v2841_v43, %v2327_v63 }
 0x7f8   : > { %2368 = vst.msk [vmem:[%s3053_s30] sm:$0xff] %vm2367_vm9, %v2328_v10 }
 0x7fd   : > { %v2329_v35 = vpop.f32.mrf.mxu1 }
 0x7fe   : > { %v2330_v5 = vadd.f32 %v2841_v43, %v2329_v35 }
 0x800   : > { %2369 = vst.msk [vmem:[%s3053_s30 + $0x8] sm:$0xff] %vm2367_vm9, %v2330_v5 }
 0x805   : > { %v2332_v18 = vpop.f32.mrf.mxu1 }
 0x806   : > { %v2333_v0 = vadd.f32 %v2841_v43, %v2332_v18 }
 0x808   : > { %2370 = vst.msk [vmem:[%s3053_s30 + $0x10] sm:$0xff] %vm2367_vm9, %v2333_v0 }
 0x80d   : > { %v2334_v17 = vpop.f32.mrf.mxu1 }
 0x80e   : > { %v2335_v60 = vadd.f32 %v2841_v43, %v2334_v17 }
 0x810   : > { %2371 = vst.msk [vmem:[%s3053_s30 + $0x18] sm:$0xff] %vm2367_vm9, %v2335_v60 }
 0x815   : > { %v2337_v30 = vpop.f32.mrf.mxu1 }
 0x816   : > { %v2338_v19 = vadd.f32 %v2841_v43, %v2337_v30 }
 0x818   : > { %2372 = vst.msk [vmem:[%s3053_s30 + $0x20] sm:$0xff] %vm2367_vm9, %v2338_v19 }
 0x81d   : > { %v2339_v45 = vpop.f32.mrf.mxu1 }
 0x81e   : > { %v2340_v26 = vadd.f32 %v2841_v43, %v2339_v45 }
 0x820   : > { %2373 = vst.msk [vmem:[%s3053_s30 + $0x28] sm:$0xff] %vm2367_vm9, %v2340_v26 }
 0x825   : > { %v2342_v20 = vpop.f32.mrf.mxu1 }
 0x826   : > { %v2343_v23 = vadd.f32 %v2841_v43, %v2342_v20 }
 0x828   : > { %2374 = vst.msk [vmem:[%s3053_s30 + $0x30] sm:$0xff] %vm2367_vm9, %v2343_v23 }
 0x82d   : > { %v2344_v48 = vpop.f32.mrf.mxu1 }
 0x82e   : > { %v2345_v9 = vadd.f32 %v2841_v43, %v2344_v48 }
 0x830   : > { %2375 = vst.msk [vmem:[%s3053_s30 + $0x38] sm:$0xff] %vm2367_vm9, %v2345_v9 }
 0x83b   : > { %v2347_v47 = vpop.f32.mrf.mxu2 }
 0x83c   : > { %v2348_v38 = vadd.f32 %v2841_v43, %v2347_v47 }
 0x83e   : > { %2376 = vst.msk [vmem:[%s3053_s30 + $0x40] sm:$0xff] %vm2367_vm9, %v2348_v38 }
 0x843   : > { %v2349_v58 = vpop.f32.mrf.mxu2 }
 0x844   : > { %v2350_v29 = vadd.f32 %v2841_v43, %v2349_v58 }
 0x846   : > { %2377 = vst.msk [vmem:[%s3053_s30 + $0x48] sm:$0xff] %vm2367_vm9, %v2350_v29 }
 0x84b   : > { %v2352_v34 = vpop.f32.mrf.mxu2 }
 0x84c   : > { %v2353_v36 = vadd.f32 %v2841_v43, %v2352_v34 }
 0x84e   : > { %2378 = vst.msk [vmem:[%s3053_s30 + $0x50] sm:$0xff] %vm2367_vm9, %v2353_v36 }
 0x853   : > { %v2354_v59 = vpop.f32.mrf.mxu2 }
 0x854   : > { %v2355_v53 = vadd.f32 %v2841_v43, %v2354_v59 }
 0x856   : > { %2379 = vst.msk [vmem:[%s3053_s30 + $0x58] sm:$0xff] %vm2367_vm9, %v2355_v53 }
 0x85b   : > { %v2357_v2 = vpop.f32.mrf.mxu2 }
 0x85c   : > { %v2358_v13 = vadd.f32 %v2841_v43, %v2357_v2 }
 0x85e   : > { %2380 = vst.msk [vmem:[%s3053_s30 + $0x60] sm:$0xff] %vm2367_vm9, %v2358_v13 }
 0x863   : > { %v2359_v44 = vpop.f32.mrf.mxu2 }
 0x864   : > { %v2360_v46 = vadd.f32 %v2841_v43, %v2359_v44 }
 0x866   : > { %2381 = vst.msk [vmem:[%s3053_s30 + $0x68] sm:$0xff] %vm2367_vm9, %v2360_v46 }
 0x86b   : > { %v2362_v50 = vpop.f32.mrf.mxu2 }
 0x86c   : > { %v2363_v4 = vadd.f32 %v2841_v43, %v2362_v50 }
 0x86e   : > { %2382 = vst.msk [vmem:[%s3053_s30 + $0x70] sm:$0xff] %vm2367_vm9, %v2363_v4 }
 0x873   : > { %v2364_v57 = vpop.f32.mrf.mxu2 }
 0x874   : > { %v2365_v56 = vadd.f32 %v2841_v43, %v2364_v57 }
 0x876   : > { %2383 = vst.msk [vmem:[%s3053_s30 + $0x78] sm:$0xff] %vm2367_vm9, %v2365_v56 }
 0x877 PF: > { %s22_s27 = sadd.s32 1, %s2928_s27   ;;  %s3917_s21 = sld [smem:[#allocation7_spill]] }
 0x878   : > { %p19_p11 = scmp.ge.s32.totalorder %s22_s27, 10   ;;  %s3918_s22 = sld [smem:[#allocation8_spill]] }
 0x879   : > { %s3919_s23 = sld [smem:[#allocation9_spill]] }
 0x87a   : > { %s3920_s24 = sld [smem:[#allocation10_spill]]  ;;  %21 = sbr.rel (!%p19_p11) target bundleno = 4 (0x4), region = 109 }
 0x87b   : > { %s3921_s25 = sld [smem:[#allocation11_spill]] }
 0x87c   : > { %s3922_s26 = sld [smem:[#allocation12_spill]] }

</bundles_post_ra>
